<compile_context>
chip_gen: v7x
topology: tpu7x:2x2x1
jax: 0.10.0
libtpu: 0.0.40
codegen_flags: <defaults>
</compile_context>

<pallas_src>
import jax
import jax.numpy as jnp
from jax.experimental import pallas as pl
from jax.experimental.pallas import tpu as pltpu


def _choose_tm(M, tm_max=2048):
    """Tile of the flattened per-image spatial axis (Hp*Wp).

    If the whole axis fits in one tile we take it full-extent (a full-dim
    block is exempt from the multiple-of-128 rule).  Otherwise pick a
    lane-dense multiple of 128 that balances the blocks.
    On v5e consider passing tm_max=1024 (single vst slot / no bf16 VPU).
    """
    if M <= tm_max:
        return M, 1
    nb = pl.cdiv(M, tm_max)
    tm = 128 * pl.cdiv(pl.cdiv(M, nb), 128)
    return tm, pl.cdiv(M, tm)


def _fused_kernel(x_ref, w1h_ref, b1h_ref, w2_ref, b2_ref, o_ref):
    """x_ref: (1, Cin, TM) f32; w1h = 0.5*w1^T (Cmid, Cin) bf16;
    b1h = 0.5*b1 (Cmid, 1) f32; w2 (Cmid, Cmid) bf16; b2 (Cmid, 1) f32;
    o_ref: (1, Cmid, TM) final dtype.  Weights/biases resident (const maps)."""
    x = x_ref[0].astype(jnp.bfloat16)                         # (Cin, TM)

    # h1 = 0.5 * v1   (w1/b1 pre-scaled by 0.5 in the wrapper)
    # K = Cin is tiny so the MXU is underutilized here, but it is nowhere
    # near the bottleneck -- left as-is per the review.
    h1 = jnp.dot(w1h_ref[...], x,
                 preferred_element_type=jnp.float32) + b1h_ref[...]   # f32

    # v2 = sigmoid(v1) = 0.5*tanh(v1/2) + 0.5 = 0.5*tanh(h1) + 0.5   (bf16)
    v2 = 0.5 * jnp.tanh(h1.astype(jnp.bfloat16)) + 0.5                # bf16

    v4 = jnp.dot(w2_ref[...], v2,
                 preferred_element_type=jnp.float32) + b2_ref[...]    # f32

    v5 = v4.astype(jnp.bfloat16) * v2                                  # bf16
    v6 = jnp.tanh(v5)                                                  # bf16
    # v7 = sigmoid(v6) = 0.5*tanh(v6/2) + 0.5
    # v8 = v1 * v7 = 2*h1 * v7 = h1 * (tanh(v6/2) + 1)
    u = jnp.tanh(0.5 * v6)                                             # bf16
    o_ref[0] = (h1 * (u.astype(jnp.float32) + 1.0)).astype(o_ref.dtype)


def fused_forward(x_nchw, w1, b1, w2, b2, out_dtype=jnp.float32, tm_max=2048):
    """x: (N, Cin, H, W) f32; w1: (Cin, Cmid); b1: (Cmid,);
    w2: (Cmid, Cmid); b2: (Cmid,).  Returns (N, Cmid, H+2, W+2) in out_dtype
    (NCHW).  out_dtype=jnp.bfloat16 halves the dominant HBM write if the
    consumer tolerates it; default f32 matches the PyTorch module."""
    N, Cin, H, W = x_nchw.shape
    Cmid = w1.shape[1]
    Hp, Wp = H + 2, W + 2
    M = Hp * Wp

    # The only wrapper-side pass over data: zero-pad the (small) Cin-wide
    # input spatially so the kernel can compute the border ring itself and
    # emit the full padded NCHW output directly.  Reshapes are free.
    x_pad = jnp.pad(x_nchw, ((0, 0), (0, 0), (1, 1), (1, 1)))
    x_flat = x_pad.reshape(N, Cin, M)                    # (N, Cin, Hp*Wp) f32

    TM, grid_m = _choose_tm(M, tm_max)

    # bf16 MXU operands; w1/b1 pre-scaled by 0.5 (exact) to fold the sigmoid
    # argument scaling into the matmul.  Biases stay f32.
    w1h = (0.5 * jnp.transpose(w1)).astype(jnp.bfloat16)   # (Cmid, Cin)
    b1h = (0.5 * b1).reshape(Cmid, 1).astype(jnp.float32)
    w2t = jnp.transpose(w2).astype(jnp.bfloat16)           # (Cmid, Cmid)
    b2c = b2.reshape(Cmid, 1).astype(jnp.float32)

    out_flat = pl.pallas_call(
        _fused_kernel,
        out_shape=jax.ShapeDtypeStruct((N, Cmid, M), out_dtype),
        grid_spec=pltpu.PrefetchScalarGridSpec(
            num_scalar_prefetch=0,
            grid=(N, grid_m),
            in_specs=[
                pl.BlockSpec((1, Cin, TM), lambda n, i: (n, 0, i)),
                pl.BlockSpec((Cmid, Cin), lambda n, i: (0, 0)),
                pl.BlockSpec((Cmid, 1), lambda n, i: (0, 0)),
                pl.BlockSpec((Cmid, Cmid), lambda n, i: (0, 0)),
                pl.BlockSpec((Cmid, 1), lambda n, i: (0, 0)),
            ],
            out_specs=pl.BlockSpec((1, Cmid, TM), lambda n, i: (n, 0, i)),
        ),
        compiler_params=pltpu.CompilerParams(
            dimension_semantics=("parallel", "parallel"),
            vmem_limit_bytes=32 * 1024 * 1024),
    )(x_flat, w1h, b1h, w2t, b2c)

    # Free reshape: (N, Cmid, Hp*Wp) is already the padded NCHW layout.
    return out_flat.reshape(N, Cmid, Hp, Wp)


def reference_forward(x_nchw, w1, b1, w2, b2):
    # Pure-JAX f32 reference of the (repaired) op graph.
    x_nhwc = jnp.transpose(x_nchw, (0, 2, 3, 1))
    x_pad = jnp.pad(x_nhwc, ((0, 0), (1, 1), (1, 1), (0, 0)))
    v1 = jnp.einsum("nhwc,cd->nhwd", x_pad, w1) + b1
    v2 = jax.nn.sigmoid(v1)
    v4 = jnp.einsum("nhwc,cd->nhwd", v2, w2) + b2
    v5 = v4 * v2
    v6 = jnp.tanh(v5)
    v7 = jax.nn.sigmoid(v6)
    v8 = v1 * v7
    return jnp.transpose(v8, (0, 3, 1, 2))


if __name__ == "__main__":
    # Small shapes consistent with the (repaired) forward.
    N, Cin, H, W = 2, 8, 16, 16
    Cmid = 128

    key = jax.random.PRNGKey(0)
    kx, kw1, kb1, kw2, kb2 = jax.random.split(key, 5)

    x = jax.random.normal(kx, (N, Cin, H, W), dtype=jnp.float32)
    # Deterministic parameter init (synthetic weights, no checkpoint load).
    w1 = jax.random.normal(kw1, (Cin, Cmid), dtype=jnp.float32) * 0.1
    b1 = jax.random.normal(kb1, (Cmid,), dtype=jnp.float32) * 0.05
    w2 = jax.random.normal(kw2, (Cmid, Cmid), dtype=jnp.float32) * 0.05
    b2 = jax.random.normal(kb2, (Cmid,), dtype=jnp.float32) * 0.05

    fused = jax.jit(fused_forward)
    out = jax.block_until_ready(fused(x, w1, b1, w2, b2))
    ref = jax.block_until_ready(reference_forward(x, w1, b1, w2, b2))

    assert out.shape == (N, Cmid, H + 2, W + 2), out.shape
    # bf16 MXU operands + bf16 elementwise chain (tanh-form sigmoid) inside
    # the kernel => slightly looser tolerance vs. the pure-f32 reference.
    max_err = float(jnp.max(jnp.abs(out - ref)))
    assert jnp.allclose(out, ref, atol=2e-2, rtol=2e-2), f"mismatch: {max_err}"

    print("KERNEL_OK")
</pallas_src>

<mosaic_0001>
module attributes {stable_mosaic.version = 11 : i64} {
  func.func @_fused_kernel(%arg0: i32, %arg1: i32, %arg2: memref<1x8x324xf32, #tpu.memory_space<vmem>>, %arg3: memref<128x8xbf16, #tpu.memory_space<vmem>>, %arg4: memref<128x1xf32, #tpu.memory_space<vmem>>, %arg5: memref<128x128xbf16, #tpu.memory_space<vmem>>, %arg6: memref<128x1xf32, #tpu.memory_space<vmem>>, %arg7: memref<1x128x324xf32, #tpu.memory_space<vmem>>) attributes {dimension_semantics = [#tpu.dimension_semantics<parallel>, #tpu.dimension_semantics<parallel>], iteration_bounds = array<i64: 2, 1>, scalar_prefetch = 0 : i64, scratch_operands = 0 : i64, tpu.core_type = #tpu.core_type<tc>, window_params = [{transform_indices = @transform_0, window_bounds = array<i64: 1, 8, 324>}, {pipeline_mode = #tpu.pipeline_mode<synchronous>, transform_indices = @transform_1, window_bounds = array<i64: 128, 8>}, {pipeline_mode = #tpu.pipeline_mode<synchronous>, transform_indices = @transform_2, window_bounds = array<i64: 128, 1>}, {pipeline_mode = #tpu.pipeline_mode<synchronous>, transform_indices = @transform_3, window_bounds = array<i64: 128, 128>}, {pipeline_mode = #tpu.pipeline_mode<synchronous>, transform_indices = @transform_4, window_bounds = array<i64: 128, 1>}, {transform_indices = @transform_5, window_bounds = array<i64: 1, 128, 324>}]} {
    %c0 = arith.constant 0 : index
    %c0_0 = arith.constant 0 : index
    %c0_1 = arith.constant 0 : index
    %0 = vector.load %arg2[%c0, %c0_0, %c0_1] : memref<1x8x324xf32, #tpu.memory_space<vmem>>, vector<1x8x324xf32>
    %1 = vector.shape_cast %0 : vector<1x8x324xf32> to vector<8x324xf32>
    %2 = arith.truncf %1 : vector<8x324xf32> to vector<8x324xbf16>
    %c0_2 = arith.constant 0 : index
    %c0_3 = arith.constant 0 : index
    %3 = vector.load %arg3[%c0_2, %c0_3] : memref<128x8xbf16, #tpu.memory_space<vmem>>, vector<128x8xbf16>
    %cst = arith.constant dense<0.000000e+00> : vector<128x324xf32>
    %4 = tpu.matmul %3, %2, %cst {dimension_numbers = #tpu.dot_dimension_numbers<[1], [0], [0], [1], [0, 0, 1, 1], [], []>} : vector<128x8xbf16>, vector<8x324xbf16>, vector<128x324xf32> -> vector<128x324xf32>
    %c0_4 = arith.constant 0 : index
    %c0_5 = arith.constant 0 : index
    %5 = vector.load %arg4[%c0_4, %c0_5] : memref<128x1xf32, #tpu.memory_space<vmem>>, vector<128x1xf32>
    %6 = vector.broadcast %5 : vector<128x1xf32> to vector<128x324xf32>
    %7 = arith.addf %4, %6 : vector<128x324xf32>
    %8 = arith.truncf %7 : vector<128x324xf32> to vector<128x324xbf16>
    %9 = math.tanh %8 : vector<128x324xbf16>
    %cst_6 = arith.constant 5.000000e-01 : bf16
    %10 = vector.broadcast %cst_6 : bf16 to vector<128x324xbf16>
    %11 = arith.mulf %10, %9 : vector<128x324xbf16>
    %cst_7 = arith.constant 5.000000e-01 : bf16
    %12 = vector.broadcast %cst_7 : bf16 to vector<128x324xbf16>
    %13 = arith.addf %11, %12 : vector<128x324xbf16>
    %c0_8 = arith.constant 0 : index
    %c0_9 = arith.constant 0 : index
    %14 = vector.load %arg5[%c0_8, %c0_9] : memref<128x128xbf16, #tpu.memory_space<vmem>>, vector<128x128xbf16>
    %cst_10 = arith.constant dense<0.000000e+00> : vector<128x324xf32>
    %15 = tpu.matmul %14, %13, %cst_10 {dimension_numbers = #tpu.dot_dimension_numbers<[1], [0], [0], [1], [0, 0, 1, 1], [], []>} : vector<128x128xbf16>, vector<128x324xbf16>, vector<128x324xf32> -> vector<128x324xf32>
    %c0_11 = arith.constant 0 : index
    %c0_12 = arith.constant 0 : index
    %16 = vector.load %arg6[%c0_11, %c0_12] : memref<128x1xf32, #tpu.memory_space<vmem>>, vector<128x1xf32>
    %17 = vector.broadcast %16 : vector<128x1xf32> to vector<128x324xf32>
    %18 = arith.addf %15, %17 : vector<128x324xf32>
    %19 = arith.truncf %18 : vector<128x324xf32> to vector<128x324xbf16>
    %20 = arith.mulf %19, %13 : vector<128x324xbf16>
    %21 = math.tanh %20 : vector<128x324xbf16>
    %cst_13 = arith.constant 5.000000e-01 : bf16
    %22 = vector.broadcast %cst_13 : bf16 to vector<128x324xbf16>
    %23 = arith.mulf %22, %21 : vector<128x324xbf16>
    %24 = math.tanh %23 : vector<128x324xbf16>
    %25 = arith.extf %24 : vector<128x324xbf16> to vector<128x324xf32>
    %cst_14 = arith.constant 1.000000e+00 : f32
    %26 = vector.broadcast %cst_14 : f32 to vector<128x324xf32>
    %27 = arith.addf %25, %26 : vector<128x324xf32>
    %28 = arith.mulf %7, %27 : vector<128x324xf32>
    %c0_15 = arith.constant 0 : index
    %c0_16 = arith.constant 0 : index
    %c0_17 = arith.constant 0 : index
    %29 = vector.load %arg7[%c0_15, %c0_16, %c0_17] : memref<1x128x324xf32, #tpu.memory_space<vmem>>, vector<1x128x324xf32>
    %30 = vector.shape_cast %29 : vector<1x128x324xf32> to vector<128x324xf32>
    %31 = vector.shape_cast %28 : vector<128x324xf32> to vector<1x128x324xf32>
    tpu.vector_store %arg7[%c0_15, %c0_16, %c0_17], %31 {strides = array<i32>} : memref<1x128x324xf32, #tpu.memory_space<vmem>>, vector<1x128x324xf32>,
    return
  }
  func.func @transform_0(%arg0: i32, %arg1: i32) -> (i32, i32, i32) {
    %c0_i32 = arith.constant 0 : i32
    %c0_i32_0 = arith.constant 0 : i32
    return %arg0, %c0_i32, %arg1 : i32, i32, i32
  }
  func.func @transform_1(%arg0: i32, %arg1: i32) -> (i32, i32) {
    %c0_i32 = arith.constant 0 : i32
    %c0_i32_0 = arith.constant 0 : i32
    %c0_i32_1 = arith.constant 0 : i32
    return %c0_i32, %c0_i32_0 : i32, i32
  }
  func.func @transform_2(%arg0: i32, %arg1: i32) -> (i32, i32) {
    %c0_i32 = arith.constant 0 : i32
    %c0_i32_0 = arith.constant 0 : i32
    %c0_i32_1 = arith.constant 0 : i32
    return %c0_i32, %c0_i32_0 : i32, i32
  }
  func.func @transform_3(%arg0: i32, %arg1: i32) -> (i32, i32) {
    %c0_i32 = arith.constant 0 : i32
    %c0_i32_0 = arith.constant 0 : i32
    %c0_i32_1 = arith.constant 0 : i32
    return %c0_i32, %c0_i32_0 : i32, i32
  }
  func.func @transform_4(%arg0: i32, %arg1: i32) -> (i32, i32) {
    %c0_i32 = arith.constant 0 : i32
    %c0_i32_0 = arith.constant 0 : i32
    %c0_i32_1 = arith.constant 0 : i32
    return %c0_i32, %c0_i32_0 : i32, i32
  }
  func.func @transform_5(%arg0: i32, %arg1: i32) -> (i32, i32, i32) {
    %c0_i32 = arith.constant 0 : i32
    %c0_i32_0 = arith.constant 0 : i32
    return %arg0, %c0_i32, %arg1 : i32, i32, i32
  }
}

</mosaic_0001>

<bundles_post_ra>
// kernel: fused_forward.1
= control target key start
LH: loop header
LB: loop body
LE: loop exit
PB: predicated region body
PF: predicated region fallthrough
CT: control target
= control target key end

     0   :  { %s1897_s18 = smov 0   ;;  %s1899_s19 = smov 0   ;;  %s2618_s0 = inlined_call_operand.vmem [shape: f32[2,8,324], index: 0, kind: input, shape index: {}]   ;;  %s2619_s1 = inlined_call_operand.vmem [shape: bf16[128,8], index: 1, kind: input, shape index: {}]   ;;  %s2620_s2 = inlined_call_operand.vmem [shape: f32[128,1], index: 2, kind: input, shape index: {}]   ;;  %s2621_s3 = inlined_call_operand.vmem [shape: bf16[128,128], index: 3, kind: input, shape index: {}]   ;;  %s2622_s4 = inlined_call_operand.vmem [shape: f32[128,1], index: 4, kind: input, shape index: {}]   ;;  %s2623_s5 = inlined_call_operand.vmem [shape: f32[2,128,324], index: 5, kind: output, shape index: {}]  }
   0x1   :  { %s1901_s20 = smov 0  }
   0x2 LB: > { %s27_s21 = sadd.s32 1, %s1860_s19  ;;  %p1539_p0 = scmp.ge.s32.totalorder %s1864_s20, 1  ;;  %s1864_s20 = sphi %s1901_s20, %s15_s20   ;;  %s1860_s19 = sphi %s1899_s19, %s2745_s19   ;;  %s1856_s18 = sphi %s1897_s18, %s2744_s18  }
   0x3   : > { %p29_p1 = scmp.ge.s32.totalorder %s27_s21, 2  ;;  %p208_p2 = scmp.lt.s32.totalorder %s1864_s20, 3 }
   0x5   : > { %s2747_s21 = smov (%p29_p1, %s27_s21), 0  ;;  %p209_p3 = pnand %p1539_p0, %p208_p2 }
   0x7   : > { %212 = sbr.rel (%p209_p3) target bundleno = 635 (0x27b), region = 40 }
   0xe   : > { %p245_p4 = scmp.lt.s32.totalorder %s1856_s18, 1  ;;  %v1682_v0 = vld [vmem:[%s2619_s1] sm:$0xff]   ;;  %v2624_v1 = vmov 0   ;;  %vm424_vm0 = vcmask 64512   ;;  %vm449_vm1 = vcmask 1043456   ;;  %v290_v9 = vld [vmem:[%s2620_s2 + $0x10] sm:$0xff] }
   0xf   : > { %491 = vmatprep.mubr.bf16.mxu0 %v2624_v1  ;;  %1680 = vset.pattern.permute.xlu0 %v2624_v1  ;;  %v288_v8 = vld [vmem:[%s2620_s2] sm:$0xff]  ;;  %v1683_v12 = vld [vmem:[%s2619_s1 + $0x8] sm:$0xff]   ;;  %v1684_v13 = vld [vmem:[%s2619_s1 + $0x10] sm:$0xff]   ;;  %vm1401_vm2 = vcmask 556032  }
  0x10   : > { %s2749_s18 = smov (!%p245_p4, %s1856_s18), 1  ;;  %1604 = vmatprep.mubr.msk.bf16.mxu1 %vm424_vm0, %v1682_v0  ;;  %1681 = vset.pattern.permute.xlu1 %v2624_v1  ;;  %v289_v14 = vld [vmem:[%s2620_s2 + $0x8] sm:$0xff]  ;;  %v291_v15 = vld [vmem:[%s2620_s2 + $0x18] sm:$0xff]  ;;  %v292_v16 = vld [vmem:[%s2620_s2 + $0x20] sm:$0xff] }
  0x11   : > { %s1653_s24 = smul.u32 24, %s2749_s18  ;;  %306 = vperm.xlu0 %1680, %v288_v8   ;;  %316 = vperm.xlu1 %1681, %v290_v9   ;;  %v293_v17 = vld [vmem:[%s2620_s2 + $0x28] sm:$0xff]  ;;  %v1685_v18 = vld [vmem:[%s2619_s1 + $0x18] sm:$0xff]   ;;  %v1686_v19 = vld [vmem:[%s2619_s1 + $0x20] sm:$0xff]  }
  0x12   : > { %v294_v20 = vld [vmem:[%s2620_s2 + $0x30] sm:$0xff]  ;;  %v295_v21 = vld [vmem:[%s2620_s2 + $0x38] sm:$0xff]  ;;  %v296_v22 = vld [vmem:[%s2620_s2 + $0x40] sm:$0xff]  ;;  %s1654_s13 = smul.u32 384, %s2749_s18 }
  0x13   : > { %s252_s27 = scalar_lea.vmem %s2618_s0, %s1653_s24  ;;  %v297_v23 = vld [vmem:[%s2620_s2 + $0x48] sm:$0xff]  ;;  %v1688_v25 = vld [vmem:[%s2619_s1 + $0x30] sm:$0xff]   ;;  %v299_v27 = vld [vmem:[%s2620_s2 + $0x58] sm:$0xff] }
  0x14   : > { %v267_v2 = vld [vmem:[%s252_s27 + $0x8] sm:$0xff]  ;;  %v268_v3 = vld [vmem:[%s252_s27 + $0x10] sm:$0xff]  ;;  %v266_v4 = vld [vmem:[%s252_s27] sm:$0xff]  ;;  %s2456_s15 = scalar_lea.vmem %s2623_s5, %s1654_s13 }
  0x15   : > { %v270_v5 = vpack.c.bf16 %v267_v2, %v267_v2  ;;  %v271_v6 = vpack.c.bf16 %v268_v3, %v268_v3  ;;  %v269_v7 = vpack.c.bf16 %v266_v4, %v266_v4  ;;  %311 = vperm.xlu0 %1680, %v289_v14   ;;  %321 = vperm.xlu1 %1681, %v291_v15   ;;  %v1687_v24 = vld [vmem:[%s2619_s1 + $0x28] sm:$0xff]   ;;  %v298_v26 = vld [vmem:[%s2620_s2 + $0x50] sm:$0xff]  ;;  %v300_v28 = vld [vmem:[%s2620_s2 + $0x60] sm:$0xff] }
  0x16   : > { %v301_v29 = vld [vmem:[%s2620_s2 + $0x68] sm:$0xff]  ;;  %v1689_v30 = vld [vmem:[%s2619_s1 + $0x38] sm:$0xff]   ;;  %v302_v31 = vld [vmem:[%s2620_s2 + $0x70] sm:$0xff] }
  0x17   : > { %1550 = vmatprep.subr.msk.bf16.mxu0 %vm449_vm1, %v270_v5  ;;  %1652 = vmatprep.subr.msk.bf16.mxu1 %vm449_vm1, %v271_v6  ;;  %v451_v10 = vsel %vm449_vm1, %v269_v7, 0  ;;  %v457_v11 = vsel %vm449_vm1, %v271_v6, 0  ;;  %v303_v32 = vld [vmem:[%s2620_s2 + $0x78] sm:$0xff]  ;;  %v781_v33 = vld [vmem:[%s2622_s4] sm:$0xff]  ;;  %v782_v34 = vld [vmem:[%s2622_s4 + $0x8] sm:$0xff] }
  0x18   : > { %460 = vmatpush1.bf16.msra.mxu0 %v451_v10  ;;  %1603 = vmatpush3.bf16.msra.mxu1 %v457_v11  ;;  %v783_v35 = vld [vmem:[%s2622_s4 + $0x10] sm:$0xff]  ;;  %v784_v36 = vld [vmem:[%s2622_s4 + $0x18] sm:$0xff]  ;;  %v785_v37 = vld [vmem:[%s2622_s4 + $0x20] sm:$0xff] }
  0x19   : > { %326 = vperm.xlu0 %1680, %v292_v16   ;;  %331 = vperm.xlu1 %1681, %v293_v17   ;;  %v786_v38 = vld [vmem:[%s2622_s4 + $0x28] sm:$0xff]  ;;  %v787_v39 = vld [vmem:[%s2622_s4 + $0x30] sm:$0xff]  ;;  %v788_v40 = vld [vmem:[%s2622_s4 + $0x38] sm:$0xff] }
  0x1a   : > { %v789_v41 = vld [vmem:[%s2622_s4 + $0x40] sm:$0xff]  ;;  %v790_v42 = vld [vmem:[%s2622_s4 + $0x48] sm:$0xff]  ;;  %v791_v43 = vld [vmem:[%s2622_s4 + $0x50] sm:$0xff] }
  0x1b   : > { %1551 = vmatmul.mubr.msk.bf16.vlgmr.msra.gmra.mrb[0].mxu0 %vm424_vm0, %v1682_v0  ;;  %1605 = vmatmul.mubr.msk.bf16.vlgmr.msra.gmra.mrb[0].mxu1 %vm424_vm0, %v1683_v12  ;;  %v792_v44 = vld [vmem:[%s2622_s4 + $0x58] sm:$0xff]  ;;  %v793_v45 = vld [vmem:[%s2622_s4 + $0x60] sm:$0xff]  ;;  %v794_v46 = vld [vmem:[%s2622_s4 + $0x68] sm:$0xff] }
  0x1c   : > { %501 = vmatprep.mubr.bf16.mxu0 %v2624_v1  ;;  %1608 = vmatprep.mubr.msk.bf16.mxu1 %vm424_vm0, %v1684_v13  ;;  %v795_v47 = vld [vmem:[%s2622_s4 + $0x70] sm:$0xff]  ;;  %v796_v48 = vld [vmem:[%s2622_s4 + $0x78] sm:$0xff]  ;;  %v2071_v49 = vld [vmem:[%s2621_s3] sm:$0xff]  }
  0x1d   : > { %336 = vperm.xlu0 %1680, %v294_v20   ;;  %341 = vperm.xlu1 %1681, %v295_v21  }
  0x21   : > { %346 = vperm.xlu0 %1680, %v296_v22   ;;  %351 = vperm.xlu1 %1681, %v297_v23  }
  0x23   : > { %1552 = vmatmul.mubr.msk.bf16.gmra.mrb[4].mxu0 %vm424_vm0, %v1683_v12  ;;  %1609 = vmatmul.mubr.msk.bf16.gmra.mrb[4].mxu1 %vm424_vm0, %v1685_v18 }
  0x24   : > { %511 = vmatprep.mubr.bf16.mxu0 %v2624_v1  ;;  %1612 = vmatprep.mubr.msk.bf16.mxu1 %vm424_vm0, %v1686_v19 }
  0x25   : > { %356 = vperm.xlu0 %1680, %v298_v26   ;;  %361 = vperm.xlu1 %1681, %v299_v27  }
  0x29   : > { %366 = vperm.xlu0 %1680, %v300_v28   ;;  %371 = vperm.xlu1 %1681, %v301_v29  }
  0x2b   : > { %1553 = vmatmul.mubr.msk.bf16.gmra.mrb[8].mxu0 %vm424_vm0, %v1684_v13  ;;  %1613 = vmatmul.mubr.msk.bf16.gmra.mrb[8].mxu1 %vm424_vm0, %v1687_v24 }
  0x2c   : > { %521 = vmatprep.mubr.bf16.mxu0 %v2624_v1  ;;  %1616 = vmatprep.mubr.msk.bf16.mxu1 %vm424_vm0, %v1688_v25 }
  0x2d   : > { %376 = vperm.xlu0 %1680, %v302_v31   ;;  %381 = vperm.xlu1 %1681, %v303_v32  }
  0x31   : > { %799 = vperm.xlu0 %1680, %v781_v33   ;;  %804 = vperm.xlu1 %1681, %v782_v34  }
  0x33   : > { %1554 = vmatmul.mubr.msk.bf16.gmra.mrb[12].mxu0 %vm424_vm0, %v1685_v18  ;;  %1617 = vmatmul.mubr.msk.bf16.gmra.mrb[12].mxu1 %vm424_vm0, %v1689_v30 }
  0x34   : > { %531 = vmatprep.mubr.bf16.mxu0 %v2624_v1  ;;  %957 = vmatprep.mubr.bf16.mxu1 %v2624_v1 }
  0x35   : > { %809 = vperm.xlu0 %1680, %v783_v35   ;;  %814 = vperm.xlu1 %1681, %v784_v36  }
  0x39   : > { %819 = vperm.xlu0 %1680, %v785_v37   ;;  %824 = vperm.xlu1 %1681, %v786_v38  }
  0x3b   : > { %1555 = vmatmul.mubr.msk.bf16.gmra.mrb[16].mxu0 %vm424_vm0, %v1686_v19 }
  0x3c   : > { %541 = vmatprep.mubr.bf16.mxu0 %v2624_v1 }
  0x3d   : > { %829 = vperm.xlu0 %1680, %v787_v39   ;;  %834 = vperm.xlu1 %1681, %v788_v40  }
  0x41   : > { %839 = vperm.xlu0 %1680, %v789_v41   ;;  %844 = vperm.xlu1 %1681, %v790_v42  }
  0x43   : > { %1556 = vmatmul.mubr.msk.bf16.gmra.mrb[20].mxu0 %vm424_vm0, %v1687_v24 }
  0x44   : > { %551 = vmatprep.mubr.bf16.mxu0 %v2624_v1 }
  0x45   : > { %849 = vperm.xlu0 %1680, %v791_v43   ;;  %854 = vperm.xlu1 %1681, %v792_v44  }
  0x49   : > { %859 = vperm.xlu0 %1680, %v793_v45   ;;  %864 = vperm.xlu1 %1681, %v794_v46  }
  0x4b   : > { %1557 = vmatmul.mubr.msk.bf16.gmra.mrb[24].mxu0 %vm424_vm0, %v1688_v25 }
  0x4c   : > { %561 = vmatprep.mubr.bf16.mxu0 %v2624_v1 }
  0x4d   : > { %869 = vperm.xlu0 %1680, %v795_v47   ;;  %874 = vperm.xlu1 %1681, %v796_v48  }
  0x53   : > { %1558 = vmatmul.mubr.msk.bf16.gmra.mrb[28].mxu0 %vm424_vm0, %v1689_v30 }
  0x54   : > { %1636 = vmatprep.mubr.bf16.mxu0 %v2071_v49 }
  0x90   : > { %v307_v50 = vpop.permute.xlu0 %306  ;;  %v317_v51 = vpop.permute.xlu1 %316 }
  0x94   : > { %v312_v52 = vpop.permute.xlu0 %311  ;;  %v322_v53 = vpop.permute.xlu1 %321 }
  0x98   : > { %v2074_v54 = vpop.permute.xlu0 %326  ;;  %v2076_v55 = vpop.permute.xlu1 %331 }
  0x9c   : > { %v2078_v56 = vpop.permute.xlu0 %336  ;;  %v2080_v57 = vpop.permute.xlu1 %341 }
  0xa0   : > { %v2082_v58 = vpop.permute.xlu0 %346  ;;  %v2084_v59 = vpop.permute.xlu1 %351 }
  0xa4   : > { %v2110_v17 = vpop.permute.xlu0 %356  ;;  %v2112_v18 = vpop.permute.xlu1 %361 }
  0xa8   : > { %v2142_v39 = vpop.permute.xlu0 %366  ;;  %v2144_v40 = vpop.permute.xlu1 %371 }
  0xee   : > { %v493_v60 = vpop.f32.mrb[0].mxu0  ;;  %v1606_v61 = vpop.f32.mrb[0].mxu1 }
  0xef   : > { %v2086_v62 = vadd.f32 %v1606_v61, %v317_v51  ;;  %v495_v63 = vpop.f32.mrb[1].mxu0  ;;  %v606_v0 = vpop.f32.mrb[1].mxu1  ;;  %v2090_v5 = vadd.f32 %v493_v60, %v307_v50 }
  0xf0   : > { %v2088_v2 = vadd.f32 %v606_v0, %v307_v50  ;;  %v497_v3 = vpop.f32.mrb[2].mxu0  ;;  %v1607_v4 = vpop.f32.mrb[2].mxu1  ;;  %v2096_v10 = vadd.f32 %v495_v63, %v307_v50 }
  0xf1   : > { %v2092_v6 = vadd.f32 %v497_v3, %v312_v52  ;;  %v2094_v7 = vadd.f32 %v1607_v4, %v322_v53  ;;  %v499_v8 = vpop.f32.mrb[3].mxu0  ;;  %v609_v9 = vpop.f32.mrb[3].mxu1 }
  0xf2   : > { %v2098_v11 = vadd.f32 %v499_v8, %v312_v52  ;;  %v2100_v12 = vadd.f32 %v609_v9, %v312_v52 }
  0xf3   : > { %v669_v13 = vpack.c.bf16 %v2092_v6, %v2090_v5  ;;  %v674_v14 = vpack.c.bf16 %v2094_v7, %v2086_v62 }
  0xf4   : > { %v670_v15 = vpack.c.bf16 %v2098_v11, %v2096_v10  ;;  %v671_v16 = vpack.c.bf16 %v2100_v12, %v2088_v2 }
  0xf5   : > { %1698 = vtanh.bf16 %v669_v13 }
  0xf6   : > { %1700 = vtanh.bf16 %v674_v14  ;;  %v503_v19 = vpop.f32.mrb[4].mxu0  ;;  %v1610_v20 = vpop.f32.mrb[4].mxu1 }
  0xf7   : > { %1702 = vtanh.bf16 %v670_v15  ;;  %v2115_v21 = vadd.f32 %v1610_v20, %v2078_v56  ;;  %v505_v22 = vpop.f32.mrb[5].mxu0  ;;  %v622_v23 = vpop.f32.mrb[5].mxu1  ;;  %v2120_v27 = vadd.f32 %v503_v19, %v317_v51 }
  0xf8   : > { %1704 = vtanh.bf16 %v671_v16  ;;  %v2118_v24 = vadd.f32 %v622_v23, %v2074_v54  ;;  %v507_v25 = vpop.f32.mrb[6].mxu0  ;;  %v1611_v26 = vpop.f32.mrb[6].mxu1  ;;  %v2127_v32 = vadd.f32 %v505_v22, %v317_v51 }
  0xf9   : > { %2667 = vst [vmem:[#allocation2_spill] sm:$0xff] %v2120_v27  ;;  %v2122_v28 = vadd.f32 %v507_v25, %v322_v53  ;;  %v2125_v29 = vadd.f32 %v1611_v26, %v2080_v57  ;;  %v509_v30 = vpop.f32.mrb[7].mxu0  ;;  %v625_v31 = vpop.f32.mrb[7].mxu1 }
  0xfa   : > { %2669 = vst [vmem:[#allocation4_spill] sm:$0xff] %v2127_v32  ;;  %v2129_v33 = vadd.f32 %v509_v30, %v322_v53  ;;  %v2132_v34 = vadd.f32 %v625_v31, %v2076_v55  ;;  %v2178_v22 = vpop.permute.xlu0 %376  ;;  %v2180_v23 = vpop.permute.xlu1 %381 }
  0xfb   : > { %2668 = vst [vmem:[#allocation3_spill] sm:$0xff] %v2122_v28  ;;  %v672_v35 = vpack.c.bf16 %v2122_v28, %v2120_v27  ;;  %v680_v36 = vpack.c.bf16 %v2125_v29, %v2115_v21 }
  0xfc   : > { %2670 = vst [vmem:[#allocation5_spill] sm:$0xff] %v2129_v33  ;;  %v673_v37 = vpack.c.bf16 %v2129_v33, %v2127_v32  ;;  %v677_v38 = vpack.c.bf16 %v2132_v34, %v2118_v24 }
  0xfd   : > { %1706 = vtanh.bf16 %v672_v35 }
  0xfe   : > { %1708 = vtanh.bf16 %v680_v36  ;;  %v513_v41 = vpop.f32.mrb[8].mxu0  ;;  %v1614_v42 = vpop.f32.mrb[8].mxu1 }
  0xff   : > { %1710 = vtanh.bf16 %v673_v37  ;;  %v2147_v43 = vadd.f32 %v1614_v42, %v2110_v17  ;;  %v515_v44 = vpop.f32.mrb[9].mxu0  ;;  %v638_v45 = vpop.f32.mrb[9].mxu1  ;;  %v2153_v53 = vadd.f32 %v513_v41, %v2074_v54 }
 0x100   : > { %v1699_v46 = vpop.eup %1698  ;;  %1712 = vtanh.bf16 %v677_v38  ;;  %v2150_v47 = vadd.f32 %v638_v45, %v2082_v58  ;;  %v517_v48 = vpop.f32.mrb[10].mxu0  ;;  %v2162_v4 = vadd.f32 %v515_v44, %v2074_v54 }
 0x101   : > { %v1615_v50 = vpop.f32.mrb[10].mxu1  ;;  %v1701_v51 = vpop.eup %1700  ;;  %v717_v52 = vmul.bf16 1056980736, %v1699_v46  ;;  %2671 = vst [vmem:[#allocation6_spill] sm:$0xff] %v2153_v53  ;;  %v2156_v60 = vadd.f32 %v517_v48, %v2076_v55 }
 0x102   : > { %v2159_v61 = vadd.f32 %v1615_v50, %v2112_v18  ;;  %v519_v63 = vpop.f32.mrb[11].mxu0  ;;  %v641_v0 = vpop.f32.mrb[11].mxu1  ;;  %2673 = vst [vmem:[#allocation8_spill] sm:$0xff] %v2162_v4  ;;  %v722_v13 = vmul.bf16 1056980736, %v1701_v51 }
 0x103   : > { %2672 = vst [vmem:[#allocation7_spill] sm:$0xff] %v2156_v60  ;;  %v1703_v3 = vpop.eup %1702  ;;  %v2165_v8 = vadd.f32 %v519_v63, %v2076_v55  ;;  %v2168_v9 = vadd.f32 %v641_v0, %v2084_v59  ;;  %v675_v15 = vpack.c.bf16 %v2156_v60, %v2153_v53  ;;  %v2182_v25 = vadd.bf16 1056980736, %v717_v52 }
 0x104   : > { %v1705_v14 = vpop.eup %1704  ;;  %v686_v16 = vpack.c.bf16 %v2159_v61, %v2147_v43  ;;  %v718_v19 = vmul.bf16 1056980736, %v1703_v3  ;;  %v2188_v36 = vadd.bf16 1056980736, %v722_v13 }
 0x105   : > { %2674 = vst [vmem:[#allocation9_spill] sm:$0xff] %v2165_v8  ;;  %v676_v20 = vpack.c.bf16 %v2165_v8, %v2162_v4  ;;  %v683_v54 = vpack.c.bf16 %v2168_v9, %v2150_v47  ;;  %v719_v55 = vmul.bf16 1056980736, %v1705_v14  ;;  %1714 = vtanh.bf16 %v675_v15 }
 0x106   : > { %v2184_v26 = vadd.bf16 1056980736, %v718_v19  ;;  %1716 = vtanh.bf16 %v686_v16  ;;  %v523_v30 = vpop.f32.mrb[12].mxu0  ;;  %v1618_v31 = vpop.f32.mrb[12].mxu1 }
 0x107   : > { %v2186_v35 = vadd.bf16 1056980736, %v719_v55  ;;  %1718 = vtanh.bf16 %v676_v20  ;;  %v2191_v37 = vadd.f32 %v1618_v31, %v2178_v22  ;;  %v525_v38 = vpop.f32.mrb[13].mxu0  ;;  %v654_v41 = vpop.f32.mrb[13].mxu1  ;;  %v2200_v51 = vadd.f32 %v523_v30, %v2078_v56 }
 0x108   : > { %925 = vmatprep.subr.bf16.mxu1 %v2184_v26  ;;  %v1707_v42 = vpop.eup %1706  ;;  %1720 = vtanh.bf16 %v683_v54  ;;  %v2196_v44 = vadd.f32 %v654_v41, %v2142_v39  ;;  %v527_v45 = vpop.f32.mrb[14].mxu0  ;;  %v2210_v14 = vadd.f32 %v525_v38, %v2078_v56 }
 0x109   : > { %1620 = vmatprep.subr.bf16.mxu0 %v2186_v35  ;;  %926 = vmatpush1.bf16.msra.mxu1 %v2182_v25  ;;  %v1619_v46 = vpop.f32.mrb[14].mxu1  ;;  %v1709_v48 = vpop.eup %1708  ;;  %v720_v50 = vmul.bf16 1056980736, %v1707_v42  ;;  %2675 = vst [vmem:[#allocation10_spill] sm:$0xff] %v2200_v51  ;;  %v2204_v52 = vadd.f32 %v527_v45, %v2080_v57 }
 0x10a   : > { %1621 = vmatpush3.bf16.msra.mxu0 %v2186_v35  ;;  %v2207_v63 = vadd.f32 %v1619_v46, %v2180_v23  ;;  %v529_v0 = vpop.f32.mrb[15].mxu0  ;;  %v657_v3 = vpop.f32.mrb[15].mxu1  ;;  %2677 = vst [vmem:[#allocation12_spill] sm:$0xff] %v2210_v14  ;;  %v728_v19 = vmul.bf16 1056980736, %v1709_v48 }
 0x10b   : > { %2676 = vst [vmem:[#allocation11_spill] sm:$0xff] %v2204_v52  ;;  %v1711_v13 = vpop.eup %1710  ;;  %v2213_v15 = vadd.f32 %v529_v0, %v2080_v57  ;;  %v2216_v16 = vadd.f32 %v657_v3, %v2144_v40  ;;  %1622 = vmatprep.subr.bf16.mxu0 %v2188_v36  ;;  %v678_v54 = vpack.c.bf16 %v2204_v52, %v2200_v51  ;;  %v2227_v38 = vadd.bf16 1056980736, %v720_v50 }
 0x10c   : > { %v1713_v20 = vpop.eup %1712  ;;  %v692_v55 = vpack.c.bf16 %v2207_v63, %v2191_v37  ;;  %v721_v30 = vmul.bf16 1056980736, %v1711_v13  ;;  %v2234_v46 = vadd.bf16 1056980736, %v728_v19 }
 0x10d   : > { %2678 = vst [vmem:[#allocation13_spill] sm:$0xff] %v2213_v15  ;;  %v679_v56 = vpack.c.bf16 %v2213_v15, %v2210_v14  ;;  %v689_v57 = vpack.c.bf16 %v2216_v16, %v2196_v44  ;;  %v725_v31 = vmul.bf16 1056980736, %v1713_v20  ;;  %1722 = vtanh.bf16 %v678_v54 }
 0x10e   : > { %1623 = vmatpush3.bf16.msra.mxu0 %v2188_v36  ;;  %v2230_v41 = vadd.bf16 1056980736, %v721_v30  ;;  %1724 = vtanh.bf16 %v692_v55  ;;  %v533_v42 = vpop.f32.mrb[16].mxu0 }
 0x10f   : > { %v2232_v45 = vadd.bf16 1056980736, %v725_v31  ;;  %1726 = vtanh.bf16 %v679_v56  ;;  %v535_v48 = vpop.f32.mrb[17].mxu0  ;;  %v2240_v20 = vadd.f32 %v533_v42, %v2082_v58 }
 0x110   : > { %927 = vmatprep.subr.bf16.mxu1 %v2230_v41  ;;  %v1715_v0 = vpop.eup %1714  ;;  %1728 = vtanh.bf16 %v689_v57  ;;  %v537_v50 = vpop.f32.mrb[18].mxu0  ;;  %v2247_v30 = vadd.f32 %v535_v48, %v2082_v58 }
 0x111   : > { %1624 = vmatprep.subr.bf16.mxu0 %v2232_v45  ;;  %928 = vmatpush1.bf16.msra.mxu1 %v2227_v38  ;;  %v1717_v3 = vpop.eup %1716  ;;  %v723_v13 = vmul.bf16 1056980736, %v1715_v0  ;;  %2679 = vst [vmem:[#allocation14_spill] sm:$0xff] %v2240_v20  ;;  %v2244_v19 = vadd.f32 %v537_v50, %v2084_v59  ;;  %v539_v54 = vpop.f32.mrb[19].mxu0 }
 0x112   : > { %1625 = vmatpush3.bf16.msra.mxu0 %v2232_v45  ;;  %v1719_v55 = vpop.eup %1718  ;;  %2681 = vst [vmem:[#allocation16_spill] sm:$0xff] %v2247_v30  ;;  %v2250_v56 = vadd.f32 %v539_v54, %v2084_v59  ;;  %v734_v57 = vmul.bf16 1056980736, %v1717_v3 }
 0x113   : > { %2680 = vst [vmem:[#allocation15_spill] sm:$0xff] %v2244_v19  ;;  %1626 = vmatprep.subr.bf16.mxu0 %v2234_v46  ;;  %v1721_v31 = vpop.eup %1720  ;;  %v681_v42 = vpack.c.bf16 %v2244_v19, %v2240_v20  ;;  %v724_v0 = vmul.bf16 1056980736, %v1719_v55  ;;  %v2257_v15 = vadd.bf16 1056980736, %v723_v13 }
 0x114   : > { %2682 = vst [vmem:[#allocation17_spill] sm:$0xff] %v2250_v56  ;;  %v682_v50 = vpack.c.bf16 %v2250_v56, %v2247_v30  ;;  %v731_v1 = vmul.bf16 1056980736, %v1721_v31  ;;  %v2264_v3 = vadd.bf16 1056980736, %v734_v57 }
 0x115   : > { %1730 = vtanh.bf16 %v681_v42  ;;  %v2260_v58 = vadd.bf16 1056980736, %v724_v0 }
 0x116   : > { %1627 = vmatpush3.bf16.msra.mxu0 %v2234_v46  ;;  %1732 = vtanh.bf16 %v682_v50  ;;  %v543_v59 = vpop.f32.mrb[20].mxu0  ;;  %v2262_v48 = vadd.bf16 1056980736, %v731_v1 }
 0x117   : > { %929 = vmatprep.subr.bf16.mxu1 %v2260_v58  ;;  %v545_v54 = vpop.f32.mrb[21].mxu0  ;;  %v2270_v42 = vadd.f32 %v543_v59, %v2110_v17 }
 0x118   : > { %v1723_v55 = vpop.eup %1722  ;;  %1628 = vmatprep.subr.bf16.mxu0 %v2262_v48  ;;  %930 = vmatpush1.bf16.msra.mxu1 %v2257_v15  ;;  %v547_v13 = vpop.f32.mrb[22].mxu0  ;;  %v2277_v56 = vadd.f32 %v545_v54, %v2110_v17 }
 0x119   : > { %v1725_v31 = vpop.eup %1724  ;;  %2683 = vst [vmem:[#allocation18_spill] sm:$0xff] %v2270_v42  ;;  %v2274_v1 = vadd.f32 %v547_v13, %v2112_v18  ;;  %v549_v57 = vpop.f32.mrb[23].mxu0  ;;  %v726_v50 = vmul.bf16 1056980736, %v1723_v55 }
 0x11a   : > { %1629 = vmatpush3.bf16.msra.mxu0 %v2262_v48  ;;  %v1727_v0 = vpop.eup %1726  ;;  %2685 = vst [vmem:[#allocation20_spill] sm:$0xff] %v2277_v56  ;;  %v2280_v30 = vadd.f32 %v549_v57, %v2112_v18  ;;  %v740_v52 = vmul.bf16 1056980736, %v1725_v31 }
 0x11b   : > { %2684 = vst [vmem:[#allocation19_spill] sm:$0xff] %v2274_v1  ;;  %1630 = vmatprep.subr.bf16.mxu0 %v2264_v3  ;;  %v1729_v19 = vpop.eup %1728  ;;  %v684_v59 = vpack.c.bf16 %v2274_v1, %v2270_v42  ;;  %v727_v20 = vmul.bf16 1056980736, %v1727_v0  ;;  %v2290_v54 = vadd.bf16 1056980736, %v726_v50 }
 0x11c   : > { %2686 = vst [vmem:[#allocation21_spill] sm:$0xff] %v2280_v30  ;;  %v685_v13 = vpack.c.bf16 %v2280_v30, %v2277_v56  ;;  %v737_v14 = vmul.bf16 1056980736, %v1729_v19  ;;  %v2297_v31 = vadd.bf16 1056980736, %v740_v52 }
 0x11d   : > { %1734 = vtanh.bf16 %v684_v59  ;;  %v2288_v17 = vadd.bf16 1056980736, %v727_v20 }
 0x11e   : > { %1631 = vmatpush3.bf16.msra.mxu0 %v2264_v3  ;;  %1736 = vtanh.bf16 %v685_v13  ;;  %v553_v18 = vpop.f32.mrb[24].mxu0  ;;  %v2292_v55 = vadd.bf16 1056980736, %v737_v14 }
 0x11f   : > { %931 = vmatprep.subr.bf16.mxu1 %v2288_v17  ;;  %v555_v57 = vpop.f32.mrb[25].mxu0  ;;  %v2300_v50 = vadd.f32 %v553_v18, %v2142_v39 }
 0x120   : > { %v1731_v0 = vpop.eup %1730  ;;  %1632 = vmatprep.subr.bf16.mxu0 %v2292_v55  ;;  %932 = vmatpush1.bf16.msra.mxu1 %v2290_v54  ;;  %v557_v19 = vpop.f32.mrb[26].mxu0  ;;  %v2307_v30 = vadd.f32 %v555_v57, %v2142_v39 }
 0x121   : > { %v1733_v59 = vpop.eup %1732  ;;  %v729_v20 = vmul.bf16 1056980736, %v1731_v0  ;;  %2687 = vst [vmem:[#allocation22_spill] sm:$0xff] %v2300_v50  ;;  %v2304_v14 = vadd.f32 %v557_v19, %v2144_v40  ;;  %v559_v13 = vpop.f32.mrb[27].mxu0  ;;  %v1691_v19 = vld [vmem:[%s2621_s3 + $0x8] sm:$0xff]  }
 0x122   : > { %1633 = vmatpush3.bf16.msra.mxu0 %v2292_v55  ;;  %2689 = vst [vmem:[#allocation24_spill] sm:$0xff] %v2307_v30  ;;  %v2311_v56 = vadd.f32 %v559_v13, %v2144_v40  ;;  %v730_v52 = vmul.bf16 1056980736, %v1733_v59  ;;  %v1692_v40 = vld [vmem:[%s2621_s3 + $0x10] sm:$0xff]  }
 0x123   : > { %2688 = vst [vmem:[#allocation23_spill] sm:$0xff] %v2304_v14  ;;  %1634 = vmatprep.subr.bf16.mxu0 %v2297_v31  ;;  %v687_v0 = vpack.c.bf16 %v2304_v14, %v2300_v50  ;;  %v2322_v39 = vadd.bf16 1056980736, %v729_v20 }
 0x124   : > { %2690 = vst [vmem:[#allocation25_spill] sm:$0xff] %v2311_v56  ;;  %v688_v18 = vpack.c.bf16 %v2311_v56, %v2307_v30  ;;  %v2317_v1 = vadd.bf16 1056980736, %v730_v52 }
 0x125   : > { %1738 = vtanh.bf16 %v687_v0 }
 0x126   : > { %2691 = vst [vmem:[#allocation26_spill] sm:$0xff] %v2317_v1  ;;  %1635 = vmatpush3.bf16.msra.mxu0 %v2297_v31  ;;  %1740 = vtanh.bf16 %v688_v18  ;;  %v563_v57 = vpop.f32.mrb[28].mxu0  ;;  %933 = vmatprep.subr.bf16.mxu1 %v2317_v1 }
 0x127   : > { %v565_v59 = vpop.f32.mrb[29].mxu0  ;;  %934 = vmatpush1.bf16.msra.mxu1 %v2322_v39  ;;  %v2331_v0 = vadd.f32 %v563_v57, %v2178_v22 }
 0x128   : > { %v1735_v13 = vpop.eup %1734  ;;  %v567_v52 = vpop.f32.mrb[30].mxu0  ;;  %v2337_v18 = vadd.f32 %v565_v59, %v2178_v22  ;;  %v1694_v22 = vld [vmem:[%s2621_s3 + $0x20] sm:$0xff]  }
 0x129   : > { %1637 = vmatmul.mubr.bf16.vlgmr.msra.gmra.mrb[32].mxu0 %v1691_v19  ;;  %v1737_v56 = vpop.eup %1736  ;;  %v732_v20 = vmul.bf16 1056980736, %v1735_v13  ;;  %2692 = vst [vmem:[#allocation27_spill] sm:$0xff] %v2331_v0  ;;  %v2334_v30 = vadd.f32 %v567_v52, %v2180_v23  ;;  %v569_v14 = vpop.f32.mrb[31].mxu0  ;;  %v1693_v52 = vld [vmem:[%s2621_s3 + $0x18] sm:$0xff]  }
 0x12a   : > { %1640 = vmatprep.mubr.bf16.mxu0 %v1692_v40  ;;  %2694 = vst [vmem:[#allocation29_spill] sm:$0xff] %v2337_v18  ;;  %v2340_v50 = vadd.f32 %v569_v14, %v2180_v23  ;;  %v733_v42 = vmul.bf16 1056980736, %v1737_v56 }
 0x12b   : > { %2693 = vst [vmem:[#allocation28_spill] sm:$0xff] %v2334_v30  ;;  %v690_v51 = vpack.c.bf16 %v2334_v30, %v2331_v0  ;;  %v2351_v8 = vadd.bf16 1056980736, %v732_v20  ;;  %v2702_v0 = vmov 0  }
 0x12c   : > { %2695 = vst [vmem:[#allocation30_spill] sm:$0xff] %v2340_v50  ;;  %v691_v13 = vpack.c.bf16 %v2340_v50, %v2337_v18  ;;  %v2346_v57 = vadd.bf16 1056980736, %v733_v42 }
 0x12d   : > { %2697 = vst [vmem:[#allocation32_spill] sm:$0xff] %v2351_v8  ;;  %1742 = vtanh.bf16 %v690_v51  ;;  %v1695_v51 = vld [vmem:[%s2621_s3 + $0x28] sm:$0xff]  }
 0x12e   : > { %2696 = vst [vmem:[#allocation31_spill] sm:$0xff] %v2346_v57  ;;  %1744 = vtanh.bf16 %v691_v13  ;;  %935 = vmatprep.subr.bf16.mxu1 %v2346_v57  ;;  %v1696_v13 = vld [vmem:[%s2621_s3 + $0x30] sm:$0xff]  }
 0x12f   : > { %936 = vmatpush1.bf16.msra.mxu1 %v2351_v8 }
 0x130   : > { %v1739_v23 = vpop.eup %1738 }
 0x131   : > { %1641 = vmatmul.mubr.bf16.gmra.mrb[36].mxu0 %v1693_v52  ;;  %v1741_v56 = vpop.eup %1740  ;;  %v735_v42 = vmul.bf16 1056980736, %v1739_v23 }
 0x132   : > { %1644 = vmatprep.mubr.bf16.mxu0 %v1694_v22  ;;  %v736_v14 = vmul.bf16 1056980736, %v1741_v56 }
 0x133   : > { %v2363_v20 = vadd.bf16 1056980736, %v735_v42  ;;  %v1697_v42 = vld [vmem:[%s2621_s3 + $0x38] sm:$0xff]  }
 0x134   : > { %v2358_v59 = vadd.bf16 1056980736, %v736_v14 }
 0x135   : > { %2699 = vst [vmem:[#allocation34_spill] sm:$0xff] %v2363_v20 }
 0x136   : > { %2698 = vst [vmem:[#allocation33_spill] sm:$0xff] %v2358_v59  ;;  %937 = vmatprep.subr.bf16.mxu1 %v2358_v59 }
 0x137   : > { %938 = vmatpush1.bf16.msra.mxu1 %v2363_v20 }
 0x138   : > { %v1743_v50 = vpop.eup %1742 }
 0x139   : > { %1645 = vmatmul.mubr.bf16.gmra.mrb[40].mxu0 %v1695_v51  ;;  %v1745_v23 = vpop.eup %1744  ;;  %v738_v56 = vmul.bf16 1056980736, %v1743_v50  ;;  %v2389_v50 = vpop.permute.xlu1 %804 }
 0x13a   : > { %1648 = vmatprep.mubr.bf16.mxu0 %v1696_v13  ;;  %v739_v14 = vmul.bf16 1056980736, %v1745_v23 }
 0x13b   : > { %v2375_v30 = vadd.bf16 1056980736, %v738_v56 }
 0x13c   : > { %v2370_v18 = vadd.bf16 1056980736, %v739_v14 }
 0x13d   : > { %2701 = vst [vmem:[#allocation36_spill] sm:$0xff] %v2375_v30 }
 0x13e   : > { %2700 = vst [vmem:[#allocation35_spill] sm:$0xff] %v2370_v18  ;;  %939 = vmatprep.subr.bf16.mxu1 %v2370_v18 }
 0x13f   : > { %940 = vmatpush1.bf16.msra.mxu1 %v2375_v30 }
 0x141   : > { %1649 = vmatmul.mubr.bf16.gmra.mrb[44].mxu0 %v1697_v42 }
 0x142   : > { %958 = vmatmul.mubr.bf16.vlgmr.msra.gmra.mrb[16].mxu1 %v2071_v49  ;;  %v2387_v49 = vpop.permute.xlu0 %799 }
 0x143   : > { %967 = vmatprep.mubr.bf16.mxu1 %v2702_v0 }
 0x14a   : > { %968 = vmatmul.mubr.bf16.gmra.mrb[20].mxu1 %v1691_v19  ;;  %v2391_v19 = vpop.permute.xlu0 %809 }
 0x14b   : > { %977 = vmatprep.mubr.bf16.mxu1 %v2702_v0 }
 0x152   : > { %978 = vmatmul.mubr.bf16.gmra.mrb[24].mxu1 %v1692_v40  ;;  %v2393_v40 = vpop.permute.xlu1 %814 }
 0x153   : > { %987 = vmatprep.mubr.bf16.mxu1 %v2702_v0 }
 0x15a   : > { %988 = vmatmul.mubr.bf16.gmra.mrb[28].mxu1 %v1693_v52  ;;  %v2395_v52 = vpop.permute.xlu0 %819 }
 0x15b   : > { %997 = vmatprep.mubr.bf16.mxu1 %v2702_v0 }
 0x15e   : > { %v2399_v23 = vpop.permute.xlu0 %829 }
 0x162   : > { %998 = vmatmul.mubr.bf16.gmra.mrb[32].mxu1 %v1694_v22  ;;  %v2397_v22 = vpop.permute.xlu1 %824  ;;  %v2407_v53 = vpop.permute.xlu0 %839 }
 0x163   : > { %1007 = vmatprep.mubr.bf16.mxu1 %v2702_v0 }
 0x166   : > { %v2401_v56 = vpop.permute.xlu1 %834 }
 0x16a   : > { %1008 = vmatmul.mubr.bf16.gmra.mrb[36].mxu1 %v1695_v51  ;;  %v2409_v20 = vpop.permute.xlu1 %844 }
 0x16b   : > { %1017 = vmatprep.mubr.bf16.mxu1 %v2702_v0 }
 0x172   : > { %1018 = vmatmul.mubr.bf16.gmra.mrb[40].mxu1 %v1696_v13 }
 0x173   : > { %1027 = vmatprep.mubr.bf16.mxu1 %v2702_v0 }
 0x17a   : > { %1028 = vmatmul.mubr.bf16.gmra.mrb[44].mxu1 %v1697_v42 }
 0x1fc   : > { %v1638_v51 = vpop.f32.mrb[32].mxu0 }
 0x1fd   : > { %v1072_v13 = vpop.f32.mrb[33].mxu0  ;;  %v1081_v14 = vadd.f32 %v1638_v51, %v2391_v19 }
 0x1fe   : > { %v1639_v0 = vpop.f32.mrb[34].mxu0  ;;  %v1073_v30 = vadd.f32 %v1072_v13, %v2387_v49 }
 0x1ff   : > { %v1084_v42 = vadd.f32 %v1639_v0, %v2393_v40  ;;  %v1075_v18 = vpop.f32.mrb[35].mxu0 }
 0x200   : > { %v1076_v4 = vadd.f32 %v1075_v18, %v2389_v50 }
 0x201   : > { %v1140_v60 = vpack.c.bf16 %v1084_v42, %v1081_v14  ;;  %v2415_v14 = vpop.permute.xlu0 %849  ;;  %v2419_v42 = vpop.permute.xlu1 %854 }
 0x202   : > { %v1137_v59 = vpack.c.bf16 %v1076_v4, %v1073_v30  ;;  %2703 = vst [vmem:[#allocation37_spill] sm:$0xff] %v2419_v42 }
 0x203   : > { %v1164_v57 = vmul.bf16 %v1140_v60, %v2188_v36 }
 0x204   : > { %v1161_v8 = vmul.bf16 %v1137_v59, %v2186_v35  ;;  %v1642_v33 = vpop.f32.mrb[36].mxu0 }
 0x205   : > { %1746 = vtanh.bf16 %v1164_v57  ;;  %v1088_v51 = vpop.f32.mrb[37].mxu0  ;;  %v1097_v32 = vadd.f32 %v1642_v33, %v2399_v23  ;;  %v2423_v59 = vpop.permute.xlu0 %859 }
 0x206   : > { %1748 = vtanh.bf16 %v1161_v8  ;;  %v1643_v0 = vpop.f32.mrb[38].mxu0  ;;  %v1089_v4 = vadd.f32 %v1088_v51, %v2395_v52  ;;  %v2425_v28 = vpop.permute.xlu1 %864 }
 0x207   : > { %v1100_v13 = vadd.f32 %v1643_v0, %v2401_v56  ;;  %v1091_v18 = vpop.f32.mrb[39].mxu0 }
 0x208   : > { %v1092_v30 = vadd.f32 %v1091_v18, %v2397_v22 }
 0x209   : > { %v1146_v60 = vpack.c.bf16 %v1100_v13, %v1097_v32 }
 0x20a   : > { %v1143_v35 = vpack.c.bf16 %v1092_v30, %v1089_v4  ;;  %v2435_v1 = vpop.permute.xlu1 %874 }
 0x20b   : > { %v1170_v36 = vmul.bf16 %v1146_v60, %v2234_v46  ;;  %2705 = vst [vmem:[#allocation39_spill] sm:$0xff] %v2435_v1 }
 0x20c   : > { %v1167_v8 = vmul.bf16 %v1143_v35, %v2232_v45  ;;  %v1646_v57 = vpop.f32.mrb[40].mxu0 }
 0x20d   : > { %1750 = vtanh.bf16 %v1170_v36  ;;  %v1104_v33 = vpop.f32.mrb[41].mxu0  ;;  %v1113_v51 = vadd.f32 %v1646_v57, %v2415_v14 }
 0x20e   : > { %1752 = vtanh.bf16 %v1167_v8  ;;  %v1647_v0 = vpop.f32.mrb[42].mxu0  ;;  %v1105_v13 = vadd.f32 %v1104_v33, %v2407_v53  ;;  %v2432_v8 = vpop.permute.xlu0 %869 }
 0x20f   : > { %v1116_v18 = vadd.f32 %v1647_v0, %v2419_v42  ;;  %v1107_v27 = vpop.f32.mrb[43].mxu0  ;;  %2704 = vst [vmem:[#allocation38_spill] sm:$0xff] %v2432_v8 }
 0x210   : > { %v1747_v32 = vpop.eup %1746  ;;  %v1108_v46 = vadd.f32 %v1107_v27, %v2409_v20 }
 0x211   : > { %v1749_v45 = vpop.eup %1748  ;;  %v1212_v4 = vmul.bf16 1056980736, %v1747_v32  ;;  %v1152_v30 = vpack.c.bf16 %v1116_v18, %v1113_v51 }
 0x212   : > { %v1209_v60 = vmul.bf16 1056980736, %v1749_v45  ;;  %v1149_v35 = vpack.c.bf16 %v1108_v46, %v1105_v13 }
 0x213   : > { %1754 = vtanh.bf16 %v1212_v4  ;;  %v1176_v36 = vmul.bf16 %v1152_v30, %v2264_v3 }
 0x214   : > { %1756 = vtanh.bf16 %v1209_v60  ;;  %v1173_v57 = vmul.bf16 %v1149_v35, %v2262_v48  ;;  %v1650_v0 = vpop.f32.mrb[44].mxu0 }
 0x215   : > { %1758 = vtanh.bf16 %v1176_v36  ;;  %v1120_v33 = vpop.f32.mrb[45].mxu0  ;;  %v959_v42 = vpop.f32.mrb[16].mxu1  ;;  %v1129_v51 = vadd.f32 %v1650_v0, %v2432_v8 }
 0x216   : > { %1760 = vtanh.bf16 %v1173_v57  ;;  %v1651_v27 = vpop.f32.mrb[46].mxu0  ;;  %v961_v13 = vpop.f32.mrb[17].mxu1  ;;  %v1121_v46 = vadd.f32 %v1120_v33, %v2423_v59  ;;  %v960_v35 = vadd.f32 %v959_v42, %v2387_v49 }
 0x217   : > { %v1132_v18 = vadd.f32 %v1651_v27, %v2435_v1  ;;  %v1123_v32 = vpop.f32.mrb[47].mxu0  ;;  %v963_v48 = vpop.f32.mrb[18].mxu1  ;;  %v962_v27 = vadd.f32 %v961_v13, %v2387_v49 }
 0x218   : > { %v1751_v3 = vpop.eup %1750  ;;  %v1124_v45 = vadd.f32 %v1123_v32, %v2425_v28  ;;  %v964_v36 = vadd.f32 %v963_v48, %v2389_v50  ;;  %v965_v57 = vpop.f32.mrb[19].mxu1 }
 0x219   : > { %v1753_v4 = vpop.eup %1752  ;;  %v1218_v30 = vmul.bf16 1056980736, %v1751_v3  ;;  %v1158_v60 = vpack.c.bf16 %v1132_v18, %v1129_v51  ;;  %v966_v1 = vadd.f32 %v965_v57, %v2389_v50 }
 0x21a   : > { %v1215_v0 = vmul.bf16 1056980736, %v1753_v4  ;;  %v1155_v8 = vpack.c.bf16 %v1124_v45, %v1121_v46  ;;  %v1135_v32 = vpack.c.bf16 %v964_v36, %v960_v35 }
 0x21b   : > { %1762 = vtanh.bf16 %v1218_v30  ;;  %v1182_v33 = vmul.bf16 %v1158_v60, %v2297_v31  ;;  %v1136_v51 = vpack.c.bf16 %v966_v1, %v962_v27 }
 0x21c   : > { %1764 = vtanh.bf16 %v1215_v0  ;;  %v1179_v3 = vmul.bf16 %v1155_v8, %v2292_v55  ;;  %v1159_v42 = vmul.bf16 %v1135_v32, %v2182_v25 }
 0x21d   : > { %1766 = vtanh.bf16 %v1182_v33  ;;  %v1160_v46 = vmul.bf16 %v1136_v51, %v2184_v26  ;;  %v969_v49 = vpop.f32.mrb[20].mxu1 }
 0x21e   : > { %v1755_v18 = vpop.eup %1754  ;;  %1768 = vtanh.bf16 %v1179_v3  ;;  %v970_v31 = vadd.f32 %v969_v49, %v2391_v19  ;;  %v971_v48 = vpop.f32.mrb[21].mxu1 }
 0x21f   : > { %v1757_v13 = vpop.eup %1756  ;;  %v1263_v50 = vunpack.c.l.bf16 %v1755_v18  ;;  %v1266_v45 = vunpack.c.h.bf16 %v1755_v18  ;;  %1770 = vtanh.bf16 %v1159_v42  ;;  %v972_v25 = vadd.f32 %v971_v48, %v2391_v19  ;;  %v973_v8 = vpop.f32.mrb[22].mxu1 }
 0x220   : > { %v1759_v4 = vpop.eup %1758  ;;  %v1257_v55 = vunpack.c.l.bf16 %v1757_v13  ;;  %v1260_v1 = vunpack.c.h.bf16 %v1757_v13  ;;  %1772 = vtanh.bf16 %v1160_v46  ;;  %v974_v26 = vadd.f32 %v973_v8, %v2393_v40  ;;  %v975_v57 = vpop.f32.mrb[23].mxu1 }
 0x221   : > { %v1761_v30 = vpop.eup %1760  ;;  %v1311_v60 = vadd.f32 1.0, %v1263_v50  ;;  %v1314_v35 = vadd.f32 1.0, %v1266_v45  ;;  %v1224_v36 = vmul.bf16 1056980736, %v1759_v4  ;;  %v976_v33 = vadd.f32 %v975_v57, %v2393_v40 }
 0x222   : > { %v1305_v0 = vadd.f32 1.0, %v1257_v55  ;;  %v1308_v27 = vadd.f32 1.0, %v1260_v1  ;;  %v1221_v19 = vmul.bf16 1056980736, %v1761_v30  ;;  %v1138_v51 = vpack.c.bf16 %v974_v26, %v970_v31 }
 0x223   : > { %v1359_v32 = vmul.f32 %v1311_v60, %v2086_v62  ;;  %v1362_v3 = vmul.f32 %v1314_v35, %v2094_v7  ;;  %1774 = vtanh.bf16 %v1224_v36  ;;  %v1139_v46 = vpack.c.bf16 %v976_v33, %v972_v25 }
 0x224   : > { %v1353_v42 = vmul.f32 %v1305_v0, %v2088_v2  ;;  %v1356_v18 = vmul.f32 %v1308_v27, %v2100_v12  ;;  %1776 = vtanh.bf16 %v1221_v19  ;;  %v1162_v49 = vmul.bf16 %v1138_v51, %v2227_v38 }
 0x225   : > { %1408 = vst.msk [vmem:[%s2456_s15 + $0x40] sm:$0xff] %vm1401_vm2, %v1359_v32  ;;  %1411 = vst.msk [vmem:[%s2456_s15 + $0x58] sm:$0xff] %vm1401_vm2, %v1362_v3  ;;  %v1163_v62 = vmul.bf16 %v1139_v46, %v2230_v41  ;;  %v979_v7 = vpop.f32.mrb[24].mxu1 }
 0x226   : > { %v1763_v13 = vpop.eup %1762  ;;  %1402 = vst.msk [vmem:[%s2456_s15 + $0x10] sm:$0xff] %vm1401_vm2, %v1353_v42  ;;  %1405 = vst.msk [vmem:[%s2456_s15 + $0x28] sm:$0xff] %vm1401_vm2, %v1356_v18  ;;  %1778 = vtanh.bf16 %v1162_v49  ;;  %v980_v12 = vadd.f32 %v979_v7, %v2395_v52  ;;  %v981_v45 = vpop.f32.mrb[25].mxu1 }
 0x227   : > { %v1765_v40 = vpop.eup %1764  ;;  %v1275_v2 = vunpack.c.l.bf16 %v1763_v13  ;;  %v1278_v50 = vunpack.c.h.bf16 %v1763_v13  ;;  %1780 = vtanh.bf16 %v1163_v62  ;;  %v982_v38 = vadd.f32 %v981_v45, %v2395_v52  ;;  %v983_v55 = vpop.f32.mrb[26].mxu1 }
 0x228   : > { %v1767_v31 = vpop.eup %1766  ;;  %v1269_v48 = vunpack.c.l.bf16 %v1765_v40  ;;  %v1272_v4 = vunpack.c.h.bf16 %v1765_v40  ;;  %v984_v41 = vadd.f32 %v983_v55, %v2397_v22  ;;  %v985_v60 = vpop.f32.mrb[27].mxu1 }
 0x229   : > { %v1769_v1 = vpop.eup %1768  ;;  %v1323_v25 = vadd.f32 1.0, %v1275_v2  ;;  %v1326_v8 = vadd.f32 1.0, %v1278_v50  ;;  %v1230_v30 = vmul.bf16 1056980736, %v1767_v31  ;;  %v986_v0 = vadd.f32 %v985_v60, %v2397_v22 }
 0x22a   : > { %v1771_v35 = vpop.eup %1770  ;;  %v1317_v36 = vadd.f32 1.0, %v1269_v48  ;;  %v1320_v26 = vadd.f32 1.0, %v1272_v4  ;;  %v1227_v57 = vmul.bf16 1056980736, %v1769_v1  ;;  %v1141_v22 = vpack.c.bf16 %v984_v41, %v980_v12 }
 0x22b   : > { %v1773_v27 = vpop.eup %1772  ;;  %v1371_v52 = vmul.f32 %v1323_v25, %v2115_v21  ;;  %v1374_v19 = vmul.f32 %v1326_v8, %v2125_v29  ;;  %1782 = vtanh.bf16 %v1230_v30  ;;  %v1207_v33 = vmul.bf16 1056980736, %v1771_v35 }
 0x22c   : > { %v1365_v32 = vmul.f32 %v1317_v36, %v2118_v24  ;;  %v1368_v3 = vmul.f32 %v1320_v26, %v2132_v34  ;;  %1784 = vtanh.bf16 %v1227_v57  ;;  %v1208_v51 = vmul.bf16 1056980736, %v1773_v27 }
 0x22d   : > { %1420 = vst.msk [vmem:[%s2456_s15 + $0xa0] sm:$0xff] %vm1401_vm2, %v1371_v52  ;;  %1423 = vst.msk [vmem:[%s2456_s15 + $0xb8] sm:$0xff] %vm1401_vm2, %v1374_v19  ;;  %1786 = vtanh.bf16 %v1207_v33  ;;  %v1142_v42 = vpack.c.bf16 %v986_v0, %v982_v38  ;;  %v989_v21 = vpop.f32.mrb[28].mxu1  ;;  %v1165_v34 = vmul.bf16 %v1141_v22, %v2257_v15 }
 0x22e   : > { %v1775_v18 = vpop.eup %1774  ;;  %1414 = vst.msk [vmem:[%s2456_s15 + $0x70] sm:$0xff] %vm1401_vm2, %v1365_v32  ;;  %1417 = vst.msk [vmem:[%s2456_s15 + $0x88] sm:$0xff] %vm1401_vm2, %v1368_v3  ;;  %1788 = vtanh.bf16 %v1208_v51  ;;  %v991_v13 = vpop.f32.mrb[29].mxu1  ;;  %v990_v40 = vadd.f32 %v989_v21, %v2399_v23 }
 0x22f   : > { %v1777_v29 = vpop.eup %1776  ;;  %v1287_v24 = vunpack.c.l.bf16 %v1775_v18  ;;  %v1290_v46 = vunpack.c.h.bf16 %v1775_v18  ;;  %v1166_v49 = vmul.bf16 %v1142_v42, %v2260_v58  ;;  %v992_v2 = vadd.f32 %v991_v13, %v2399_v23  ;;  %v993_v50 = vpop.f32.mrb[30].mxu1 }
 0x230   : > { %v1281_v62 = vunpack.c.l.bf16 %v1777_v29  ;;  %v1284_v7 = vunpack.c.h.bf16 %v1777_v29  ;;  %1790 = vtanh.bf16 %v1165_v34  ;;  %v994_v31 = vadd.f32 %v993_v50, %v2401_v56  ;;  %v995_v48 = vpop.f32.mrb[31].mxu1 }
 0x231   : > { %v1335_v12 = vadd.f32 1.0, %v1287_v24  ;;  %v1338_v45 = vadd.f32 1.0, %v1290_v46  ;;  %v1779_v4 = vpop.eup %1778  ;;  %1792 = vtanh.bf16 %v1166_v49  ;;  %v996_v58 = vadd.f32 %v995_v48, %v2401_v56 }
 0x232   : > { %v1329_v15 = vadd.f32 1.0, %v1281_v62  ;;  %v1332_v38 = vadd.f32 1.0, %v1284_v7  ;;  %v1781_v55 = vpop.eup %1780  ;;  %v1210_v25 = vmul.bf16 1056980736, %v1779_v4  ;;  %v1144_v8 = vpack.c.bf16 %v994_v31, %v990_v40 }
 0x233   : > { %v1383_v23 = vmul.f32 %v1335_v12, %v2147_v43  ;;  %v1386_v1 = vmul.f32 %v1338_v45, %v2159_v61  ;;  %v1211_v60 = vmul.bf16 1056980736, %v1781_v55  ;;  %v1145_v35 = vpack.c.bf16 %v996_v58, %v992_v2 }
 0x234   : > { %v1377_v30 = vmul.f32 %v1329_v15, %v2150_v47  ;;  %v1380_v41 = vmul.f32 %v1332_v38, %v2168_v9  ;;  %1794 = vtanh.bf16 %v1210_v25  ;;  %v1168_v56 = vmul.bf16 %v1144_v8, %v2290_v54  ;;  %v2706_v25 = vld [vmem:[#allocation37_spill] sm:$0xff] }
 0x235   : > { %1432 = vst.msk [vmem:[%s2456_s15 + $0x100] sm:$0xff] %vm1401_vm2, %v1383_v23  ;;  %1435 = vst.msk [vmem:[%s2456_s15 + $0x118] sm:$0xff] %vm1401_vm2, %v1386_v1  ;;  %1796 = vtanh.bf16 %v1211_v60  ;;  %v1169_v43 = vmul.bf16 %v1145_v35, %v2288_v17  ;;  %v999_v47 = vpop.f32.mrb[32].mxu1 }
 0x236   : > { %v1783_v36 = vpop.eup %1782  ;;  %1426 = vst.msk [vmem:[%s2456_s15 + $0xd0] sm:$0xff] %vm1401_vm2, %v1377_v30  ;;  %1429 = vst.msk [vmem:[%s2456_s15 + $0xe8] sm:$0xff] %vm1401_vm2, %v1380_v41  ;;  %1798 = vtanh.bf16 %v1168_v56  ;;  %v1000_v57 = vadd.f32 %v999_v47, %v2407_v53  ;;  %v1001_v0 = vpop.f32.mrb[33].mxu1  ;;  %v2707_v56 = vld [vmem:[#allocation26_spill] sm:$0xff] }
 0x237   : > { %v1785_v61 = vpop.eup %1784  ;;  %v1299_v9 = vunpack.c.l.bf16 %v1783_v36  ;;  %v1302_v26 = vunpack.c.h.bf16 %v1783_v36  ;;  %1800 = vtanh.bf16 %v1169_v43  ;;  %v1002_v54 = vadd.f32 %v1001_v0, %v2407_v53  ;;  %v1003_v33 = vpop.f32.mrb[34].mxu1  ;;  %v2708_v0 = vld [vmem:[#allocation2_spill] sm:$0xff] }
 0x238   : > { %v1787_v27 = vpop.eup %1786  ;;  %v1293_v52 = vunpack.c.l.bf16 %v1785_v61  ;;  %v1296_v19 = vunpack.c.h.bf16 %v1785_v61  ;;  %v1005_v42 = vpop.f32.mrb[35].mxu1 }
 0x239   : > { %v1789_v32 = vpop.eup %1788  ;;  %v1347_v3 = vadd.f32 1.0, %v1299_v9  ;;  %v1350_v51 = vadd.f32 1.0, %v1302_v26  ;;  %v1255_v22 = vunpack.c.l.bf16 %v1787_v27  ;;  %v1258_v17 = vunpack.c.h.bf16 %v1787_v27 }
 0x23a   : > { %v1341_v18 = vadd.f32 1.0, %v1293_v52  ;;  %v1344_v21 = vadd.f32 1.0, %v1296_v19  ;;  %v1256_v29 = vunpack.c.l.bf16 %v1789_v32  ;;  %v1259_v24 = vunpack.c.h.bf16 %v1789_v32  ;;  %v2709_v52 = vld [vmem:[#allocation3_spill] sm:$0xff] }
 0x23b   : > { %v1395_v46 = vmul.f32 %v1347_v3, %v2191_v37  ;;  %v1398_v34 = vmul.f32 %v1350_v51, %v2207_v63  ;;  %v1303_v53 = vadd.f32 1.0, %v1255_v22  ;;  %v1306_v49 = vadd.f32 1.0, %v1258_v17  ;;  %v1791_v13 = vpop.eup %1790  ;;  %v2711_v3 = vld [vmem:[#allocation5_spill] sm:$0xff] }
 0x23c   : > { %v1389_v62 = vmul.f32 %v1341_v18, %v2196_v44  ;;  %v1392_v7 = vmul.f32 %v1344_v21, %v2216_v16  ;;  %v1304_v40 = vadd.f32 1.0, %v1256_v29  ;;  %v1307_v2 = vadd.f32 1.0, %v1259_v24  ;;  %v1793_v50 = vpop.eup %1792  ;;  %v2713_v29 = vld [vmem:[#allocation31_spill] sm:$0xff] }
 0x23d   : > { %1444 = vst.msk [vmem:[%s2456_s15 + $0x160] sm:$0xff] %vm1401_vm2, %v1395_v46  ;;  %1447 = vst.msk [vmem:[%s2456_s15 + $0x178] sm:$0xff] %vm1401_vm2, %v1398_v34  ;;  %v1351_v37 = vmul.f32 %v1303_v53, %v2090_v5  ;;  %v1354_v63 = vmul.f32 %v1306_v49, %v2092_v6  ;;  %v1213_v12 = vmul.bf16 1056980736, %v1791_v13  ;;  %v1004_v44 = vadd.f32 %v1003_v33, %v2409_v20  ;;  %v1009_v4 = vpop.f32.mrb[36].mxu1  ;;  %v2710_v33 = vld [vmem:[#allocation4_spill] sm:$0xff] }
 0x23e   : > { %1438 = vst.msk [vmem:[%s2456_s15 + $0x130] sm:$0xff] %vm1401_vm2, %v1389_v62  ;;  %1441 = vst.msk [vmem:[%s2456_s15 + $0x148] sm:$0xff] %vm1401_vm2, %v1392_v7  ;;  %v1352_v16 = vmul.f32 %v1304_v40, %v2096_v10  ;;  %v1355_v45 = vmul.f32 %v1307_v2, %v2098_v11  ;;  %v1214_v31 = vmul.bf16 1056980736, %v1793_v50  ;;  %v1006_v48 = vadd.f32 %v1005_v42, %v2409_v20  ;;  %v1011_v6 = vpop.f32.mrb[37].mxu1  ;;  %v2712_v42 = vld [vmem:[#allocation32_spill] sm:$0xff] }
 0x23f   : > { %1399 = vst [vmem:[%s2456_s15] sm:$0xff] %v1351_v37  ;;  %1403 = vst [vmem:[%s2456_s15 + $0x18] sm:$0xff] %v1354_v63  ;;  %1802 = vtanh.bf16 %v1213_v12  ;;  %v1147_v5 = vpack.c.bf16 %v1004_v44, %v1000_v57  ;;  %v1795_v15 = vpop.eup %1794  ;;  %v1010_v58 = vadd.f32 %v1009_v4, %v2415_v14  ;;  %v1012_v10 = vadd.f32 %v1011_v6, %v2415_v14  ;;  %v1013_v55 = vpop.f32.mrb[38].mxu1 }
 0x240   : > { %1400 = vst [vmem:[%s2456_s15 + $0x8] sm:$0xff] %v1352_v16  ;;  %1404 = vst [vmem:[%s2456_s15 + $0x20] sm:$0xff] %v1355_v45  ;;  %1804 = vtanh.bf16 %v1214_v31  ;;  %v1148_v38 = vpack.c.bf16 %v1006_v48, %v1002_v54  ;;  %v1797_v11 = vpop.eup %1796  ;;  %v1261_v23 = vunpack.c.l.bf16 %v1795_v15  ;;  %v1264_v1 = vunpack.c.h.bf16 %v1795_v15  ;;  %v1015_v30 = vpop.f32.mrb[39].mxu1  ;;  %v2714_v31 = vld [vmem:[#allocation34_spill] sm:$0xff]  ;;  %v2715_v15 = vld [vmem:[#allocation33_spill] sm:$0xff] }
 0x241   : > { %v1171_v20 = vmul.bf16 %v1147_v5, %v2322_v39  ;;  %v1014_v8 = vadd.f32 %v1013_v55, %v2706_v25  ;;  %v1799_v41 = vpop.eup %1798  ;;  %v1262_v60 = vunpack.c.l.bf16 %v1797_v11  ;;  %v1265_v35 = vunpack.c.h.bf16 %v1797_v11  ;;  %v2717_v55 = vld [vmem:[#allocation7_spill] sm:$0xff] }
 0x242   : > { %v1172_v36 = vmul.bf16 %v1148_v38, %v2707_v56  ;;  %v1016_v43 = vadd.f32 %v1015_v30, %v2706_v25  ;;  %v1801_v47 = vpop.eup %1800  ;;  %v1309_v61 = vadd.f32 1.0, %v1261_v23  ;;  %v1312_v9 = vadd.f32 1.0, %v1264_v1  ;;  %v2718_v25 = vld [vmem:[#allocation8_spill] sm:$0xff]  ;;  %v2719_v30 = vld [vmem:[#allocation9_spill] sm:$0xff] }
 0x243   : > { %v1216_v14 = vmul.bf16 1056980736, %v1799_v41  ;;  %1806 = vtanh.bf16 %v1171_v20  ;;  %v1310_v26 = vadd.f32 1.0, %v1262_v60  ;;  %v1313_v57 = vadd.f32 1.0, %v1265_v35 }
 0x244   : > { %v1217_v39 = vmul.bf16 1056980736, %v1801_v47  ;;  %1808 = vtanh.bf16 %v1172_v36  ;;  %v1357_v27 = vmul.f32 %v1309_v61, %v2708_v0  ;;  %v1360_v19 = vmul.f32 %v1312_v9, %v2709_v52  ;;  %v2721_v0 = vld [vmem:[#allocation39_spill] sm:$0xff] }
 0x245   : > { %1810 = vtanh.bf16 %v1216_v14  ;;  %v1150_v54 = vpack.c.bf16 %v1014_v8, %v1010_v58  ;;  %v1358_v32 = vmul.f32 %v1310_v26, %v2710_v33  ;;  %v1361_v51 = vmul.f32 %v1313_v57, %v2711_v3  ;;  %v1019_v17 = vpop.f32.mrb[40].mxu1  ;;  %v2716_v58 = vld [vmem:[#allocation6_spill] sm:$0xff] }
 0x246   : > { %1812 = vtanh.bf16 %v1217_v39  ;;  %v1151_v22 = vpack.c.bf16 %v1016_v43, %v1012_v10  ;;  %1406 = vst [vmem:[%s2456_s15 + $0x30] sm:$0xff] %v1357_v27  ;;  %1409 = vst [vmem:[%s2456_s15 + $0x48] sm:$0xff] %v1360_v19  ;;  %v1021_v21 = vpop.f32.mrb[41].mxu1  ;;  %v1020_v34 = vadd.f32 %v1019_v17, %v2423_v59  ;;  %v2720_v14 = vld [vmem:[#allocation38_spill] sm:$0xff]  ;;  %v2723_v17 = vld [vmem:[#allocation11_spill] sm:$0xff] }
 0x247   : > { %v1174_v18 = vmul.bf16 %v1150_v54, %v2712_v42  ;;  %1407 = vst [vmem:[%s2456_s15 + $0x38] sm:$0xff] %v1358_v32  ;;  %1410 = vst [vmem:[%s2456_s15 + $0x50] sm:$0xff] %v1361_v51  ;;  %v1023_v46 = vpop.f32.mrb[42].mxu1  ;;  %v1022_v62 = vadd.f32 %v1021_v21, %v2423_v59  ;;  %v2722_v51 = vld [vmem:[#allocation10_spill] sm:$0xff] }
 0x248   : > { %v1175_v24 = vmul.bf16 %v1151_v22, %v2713_v29  ;;  %v1024_v53 = vadd.f32 %v1023_v46, %v2425_v28  ;;  %v1025_v49 = vpop.f32.mrb[43].mxu1  ;;  %v2724_v29 = vld [vmem:[#allocation12_spill] sm:$0xff]  ;;  %v2725_v46 = vld [vmem:[#allocation13_spill] sm:$0xff] }
 0x249   : > { %1814 = vtanh.bf16 %v1174_v18  ;;  %v1026_v7 = vadd.f32 %v1025_v49, %v2425_v28 }
 0x24a   : > { %v1803_v13 = vpop.eup %1802  ;;  %1816 = vtanh.bf16 %v1175_v24  ;;  %v1153_v37 = vpack.c.bf16 %v1024_v53, %v1020_v34 }
 0x24b   : > { %v1805_v40 = vpop.eup %1804  ;;  %v1267_v2 = vunpack.c.l.bf16 %v1803_v13  ;;  %v1270_v50 = vunpack.c.h.bf16 %v1803_v13  ;;  %v1154_v44 = vpack.c.bf16 %v1026_v7, %v1022_v62  ;;  %v2726_v13 = vld [vmem:[#allocation36_spill] sm:$0xff]  ;;  %v2727_v7 = vld [vmem:[#allocation35_spill] sm:$0xff] }
 0x24c   : > { %v1268_v63 = vunpack.c.l.bf16 %v1805_v40  ;;  %v1271_v12 = vunpack.c.h.bf16 %v1805_v40  ;;  %v1177_v48 = vmul.bf16 %v1153_v37, %v2714_v31 }
 0x24d   : > { %v1315_v16 = vadd.f32 1.0, %v1267_v2  ;;  %v1318_v45 = vadd.f32 1.0, %v1270_v50  ;;  %v1178_v38 = vmul.bf16 %v1154_v44, %v2715_v15  ;;  %v1029_v59 = vpop.f32.mrb[44].mxu1 }
 0x24e   : > { %v1807_v4 = vpop.eup %1806  ;;  %v1316_v5 = vadd.f32 1.0, %v1268_v63  ;;  %v1319_v6 = vadd.f32 1.0, %v1271_v12  ;;  %1818 = vtanh.bf16 %v1177_v48  ;;  %v1031_v1 = vpop.f32.mrb[45].mxu1  ;;  %v1030_v26 = vadd.f32 %v1029_v59, %v2720_v14 }
 0x24f   : > { %v1809_v28 = vpop.eup %1808  ;;  %v1363_v10 = vmul.f32 %v1315_v16, %v2716_v58  ;;  %v1366_v11 = vmul.f32 %v1318_v45, %v2717_v55  ;;  %v1219_v23 = vmul.bf16 1056980736, %v1807_v4  ;;  %1820 = vtanh.bf16 %v1178_v38  ;;  %v1033_v35 = vpop.f32.mrb[46].mxu1  ;;  %v2728_v38 = vld [vmem:[#allocation14_spill] sm:$0xff]  ;;  %v2730_v55 = vld [vmem:[#allocation16_spill] sm:$0xff] }
 0x250   : > { %v1811_v20 = vpop.eup %1810  ;;  %v1364_v8 = vmul.f32 %v1316_v5, %v2718_v25  ;;  %v1367_v41 = vmul.f32 %v1319_v6, %v2719_v30  ;;  %v1220_v60 = vmul.bf16 1056980736, %v1809_v28  ;;  %v1035_v47 = vpop.f32.mrb[47].mxu1  ;;  %v1034_v27 = vadd.f32 %v1033_v35, %v2721_v0  ;;  %v2729_v28 = vld [vmem:[#allocation15_spill] sm:$0xff] }
 0x251   : > { %v1813_v56 = vpop.eup %1812  ;;  %1412 = vst [vmem:[%s2456_s15 + $0x60] sm:$0xff] %v1363_v10  ;;  %1415 = vst [vmem:[%s2456_s15 + $0x78] sm:$0xff] %v1366_v11  ;;  %v1273_v36 = vunpack.c.l.bf16 %v1811_v20  ;;  %v1276_v43 = vunpack.c.h.bf16 %v1811_v20  ;;  %1822 = vtanh.bf16 %v1219_v23  ;;  %v1036_v52 = vadd.f32 %v1035_v47, %v2721_v0  ;;  %v2731_v23 = vld [vmem:[#allocation17_spill] sm:$0xff] }
 0x252   : > { %1413 = vst [vmem:[%s2456_s15 + $0x68] sm:$0xff] %v1364_v8  ;;  %1416 = vst [vmem:[%s2456_s15 + $0x80] sm:$0xff] %v1367_v41  ;;  %v1274_v61 = vunpack.c.l.bf16 %v1813_v56  ;;  %v1277_v9 = vunpack.c.h.bf16 %v1813_v56  ;;  %1824 = vtanh.bf16 %v1220_v60  ;;  %v1032_v32 = vadd.f32 %v1031_v1, %v2720_v14  ;;  %v2732_v14 = vld [vmem:[#allocation18_spill] sm:$0xff] }
 0x253   : > { %v1321_v57 = vadd.f32 1.0, %v1273_v36  ;;  %v1324_v39 = vadd.f32 1.0, %v1276_v43  ;;  %v1156_v21 = vpack.c.bf16 %v1034_v27, %v1030_v26  ;;  %v2734_v27 = vld [vmem:[#allocation20_spill] sm:$0xff] }
 0x254   : > { %v1815_v19 = vpop.eup %1814  ;;  %v1322_v54 = vadd.f32 1.0, %v1274_v61  ;;  %v1325_v33 = vadd.f32 1.0, %v1277_v9  ;;  %v1157_v49 = vpack.c.bf16 %v1036_v52, %v1032_v32 }
 0x255   : > { %v1817_v3 = vpop.eup %1816  ;;  %v1369_v22 = vmul.f32 %v1321_v57, %v2722_v51  ;;  %v1372_v42 = vmul.f32 %v1324_v39, %v2723_v17  ;;  %v1222_v18 = vmul.bf16 1056980736, %v1815_v19  ;;  %v1180_v62 = vmul.bf16 %v1156_v21, %v2726_v13  ;;  %v2733_v57 = vld [vmem:[#allocation19_spill] sm:$0xff]  ;;  %v2735_v19 = vld [vmem:[#allocation21_spill] sm:$0xff] }
 0x256   : > { %v1370_v24 = vmul.f32 %v1322_v54, %v2724_v29  ;;  %v1373_v34 = vmul.f32 %v1325_v33, %v2725_v46  ;;  %v1223_v53 = vmul.bf16 1056980736, %v1817_v3  ;;  %v1181_v40 = vmul.bf16 %v1157_v49, %v2727_v7  ;;  %v2736_v29 = vld [vmem:[#allocation22_spill] sm:$0xff]  ;;  %v2737_v46 = vld [vmem:[#allocation23_spill] sm:$0xff]  ;;  %v2739_v13 = vld [vmem:[#allocation25_spill] sm:$0xff] }
 0x257   : > { %1418 = vst [vmem:[%s2456_s15 + $0x90] sm:$0xff] %v1369_v22  ;;  %1421 = vst [vmem:[%s2456_s15 + $0xa8] sm:$0xff] %v1372_v42  ;;  %1826 = vtanh.bf16 %v1222_v18 }
 0x258   : > { %1419 = vst [vmem:[%s2456_s15 + $0x98] sm:$0xff] %v1370_v24  ;;  %1422 = vst [vmem:[%s2456_s15 + $0xb0] sm:$0xff] %v1373_v34  ;;  %1828 = vtanh.bf16 %v1223_v53  ;;  %v2738_v53 = vld [vmem:[#allocation24_spill] sm:$0xff] }
 0x259   : > { %1830 = vtanh.bf16 %v1180_v62  ;;  %v1819_v2 = vpop.eup %1818 }
 0x25a   : > { %1832 = vtanh.bf16 %v1181_v40  ;;  %v1821_v50 = vpop.eup %1820  ;;  %v1225_v37 = vmul.bf16 1056980736, %v1819_v2 }
 0x25b   : > { %v1226_v12 = vmul.bf16 1056980736, %v1821_v50 }
 0x25c   : > { %v1823_v63 = vpop.eup %1822  ;;  %1834 = vtanh.bf16 %v1225_v37 }
 0x25d   : > { %v1825_v44 = vpop.eup %1824  ;;  %v1279_v16 = vunpack.c.l.bf16 %v1823_v63  ;;  %v1282_v45 = vunpack.c.h.bf16 %v1823_v63  ;;  %1836 = vtanh.bf16 %v1226_v12 }
 0x25e   : > { %v1280_v31 = vunpack.c.l.bf16 %v1825_v44  ;;  %v1283_v48 = vunpack.c.h.bf16 %v1825_v44 }
 0x25f   : > { %v1327_v4 = vadd.f32 1.0, %v1279_v16  ;;  %v1330_v5 = vadd.f32 1.0, %v1282_v45 }
 0x260   : > { %v1328_v6 = vadd.f32 1.0, %v1280_v31  ;;  %v1331_v15 = vadd.f32 1.0, %v1283_v48  ;;  %v2740_v31 = vld [vmem:[#allocation27_spill] sm:$0xff] }
 0x261   : > { %v1375_v59 = vmul.f32 %v1327_v4, %v2728_v38  ;;  %v1378_v58 = vmul.f32 %v1330_v5, %v2729_v28  ;;  %v2741_v4 = vld [vmem:[#allocation28_spill] sm:$0xff]  ;;  %v2743_v38 = vld [vmem:[#allocation30_spill] sm:$0xff] }
 0x262   : > { %v1827_v10 = vpop.eup %1826  ;;  %v1376_v11 = vmul.f32 %v1328_v6, %v2730_v55  ;;  %v1379_v1 = vmul.f32 %v1331_v15, %v2731_v23  ;;  %v2742_v6 = vld [vmem:[#allocation29_spill] sm:$0xff] }
 0x263   : > { %v1829_v20 = vpop.eup %1828  ;;  %1424 = vst [vmem:[%s2456_s15 + $0xc0] sm:$0xff] %v1375_v59  ;;  %1427 = vst [vmem:[%s2456_s15 + $0xd8] sm:$0xff] %v1378_v58  ;;  %v1285_v25 = vunpack.c.l.bf16 %v1827_v10  ;;  %v1288_v8 = vunpack.c.h.bf16 %v1827_v10 }
 0x264   : > { %v1831_v30 = vpop.eup %1830  ;;  %1425 = vst [vmem:[%s2456_s15 + $0xc8] sm:$0xff] %v1376_v11  ;;  %1428 = vst [vmem:[%s2456_s15 + $0xe0] sm:$0xff] %v1379_v1  ;;  %v1286_v41 = vunpack.c.l.bf16 %v1829_v20  ;;  %v1289_v60 = vunpack.c.h.bf16 %v1829_v20 }
 0x265   : > { %v1833_v35 = vpop.eup %1832  ;;  %v1333_v56 = vadd.f32 1.0, %v1285_v25  ;;  %v1336_v36 = vadd.f32 1.0, %v1288_v8  ;;  %v1228_v43 = vmul.bf16 1056980736, %v1831_v30 }
 0x266   : > { %v1334_v47 = vadd.f32 1.0, %v1286_v41  ;;  %v1337_v61 = vadd.f32 1.0, %v1289_v60  ;;  %v1229_v9 = vmul.bf16 1056980736, %v1833_v35 }
 0x267   : > { %v1381_v26 = vmul.f32 %v1333_v56, %v2732_v14  ;;  %v1384_v39 = vmul.f32 %v1336_v36, %v2733_v57  ;;  %1838 = vtanh.bf16 %v1228_v43  ;;  %v1835_v0 = vpop.eup %1834 }
 0x268   : > { %v1382_v52 = vmul.f32 %v1334_v47, %v2734_v27  ;;  %v1385_v54 = vmul.f32 %v1337_v61, %v2735_v19  ;;  %1840 = vtanh.bf16 %v1229_v9  ;;  %v1837_v33 = vpop.eup %1836  ;;  %v1291_v32 = vunpack.c.l.bf16 %v1835_v0 }
 0x269   : > { %1430 = vst [vmem:[%s2456_s15 + $0xf0] sm:$0xff] %v1381_v26  ;;  %1433 = vst [vmem:[%s2456_s15 + $0x108] sm:$0xff] %v1384_v39  ;;  %v1294_v3 = vunpack.c.h.bf16 %v1835_v0  ;;  %v1292_v51 = vunpack.c.l.bf16 %v1837_v33  ;;  %v1295_v22 = vunpack.c.h.bf16 %v1837_v33 }
 0x26a   : > { %1431 = vst [vmem:[%s2456_s15 + $0xf8] sm:$0xff] %v1382_v52  ;;  %1434 = vst [vmem:[%s2456_s15 + $0x110] sm:$0xff] %v1385_v54  ;;  %v1339_v17 = vadd.f32 1.0, %v1291_v32 }
 0x26b   : > { %v1342_v42 = vadd.f32 1.0, %v1294_v3  ;;  %v1340_v18 = vadd.f32 1.0, %v1292_v51  ;;  %v1343_v21 = vadd.f32 1.0, %v1295_v22 }
 0x26c   : > { %v1387_v24 = vmul.f32 %v1339_v17, %v2736_v29 }
 0x26d   : > { %v1390_v34 = vmul.f32 %v1342_v42, %v2737_v46  ;;  %v1388_v49 = vmul.f32 %v1340_v18, %v2738_v53  ;;  %v1391_v62 = vmul.f32 %v1343_v21, %v2739_v13 }
 0x26e   : > { %1436 = vst [vmem:[%s2456_s15 + $0x120] sm:$0xff] %v1387_v24 }
 0x26f   : > { %1439 = vst [vmem:[%s2456_s15 + $0x138] sm:$0xff] %v1390_v34  ;;  %1437 = vst [vmem:[%s2456_s15 + $0x128] sm:$0xff] %v1388_v49 }
 0x270   : > { %1440 = vst [vmem:[%s2456_s15 + $0x140] sm:$0xff] %v1391_v62 }
 0x272   : > { %v1839_v7 = vpop.eup %1838 }
 0x273   : > { %v1841_v40 = vpop.eup %1840  ;;  %v1297_v2 = vunpack.c.l.bf16 %v1839_v7  ;;  %v1300_v50 = vunpack.c.h.bf16 %v1839_v7 }
 0x274   : > { %v1298_v37 = vunpack.c.l.bf16 %v1841_v40  ;;  %v1301_v63 = vunpack.c.h.bf16 %v1841_v40 }
 0x275   : > { %v1345_v12 = vadd.f32 1.0, %v1297_v2  ;;  %v1348_v44 = vadd.f32 1.0, %v1300_v50 }
 0x276   : > { %v1346_v16 = vadd.f32 1.0, %v1298_v37  ;;  %v1349_v45 = vadd.f32 1.0, %v1301_v63 }
 0x277   : > { %v1393_v48 = vmul.f32 %v1345_v12, %v2740_v31  ;;  %v1396_v5 = vmul.f32 %v1348_v44, %v2741_v4 }
 0x278   : > { %v1394_v15 = vmul.f32 %v1346_v16, %v2742_v6  ;;  %v1397_v59 = vmul.f32 %v1349_v45, %v2743_v38 }
 0x279   : > { %1442 = vst [vmem:[%s2456_s15 + $0x150] sm:$0xff] %v1393_v48  ;;  %1445 = vst [vmem:[%s2456_s15 + $0x168] sm:$0xff] %v1396_v5 }
 0x27a   : > { %1443 = vst [vmem:[%s2456_s15 + $0x158] sm:$0xff] %v1394_v15  ;;  %1446 = vst [vmem:[%s2456_s15 + $0x170] sm:$0xff] %v1397_v59 }
 0x27b PF: > { %s15_s20 = sadd.s32 1, %s1864_s20   ;;  %s2744_s18 = smov %s1860_s19 }
 0x27c   : > { %p12_p5 = scmp.ge.s32.totalorder %s15_s20, 4   ;;  %s2745_s19 = smov %s2747_s21 }
 0x27e   :  { %14 = sbr.rel (!%p12_p5) target bundleno = 2 (0x2), region = 70 }

</bundles_post_ra>
